<compile_context>
chip_gen: v7x
topology: tpu7x:2x2x1
jax: 0.10.0
libtpu: 0.0.40
codegen_flags: <defaults>
</compile_context>

<pallas_src>
import functools

import jax
import jax.numpy as jnp
from jax.experimental import pallas as pl
from jax.experimental.pallas import tpu as pltpu


def _forward_kernel(xs_ref, h0_ref, c0_ref,
                    w_pack_ref, b_pack_ref, w_ih_ref, w_hh_ref, b_lstm_ref,
                    probs_ref, h_out_ref, c_out_ref, h_hist_ref):
    """All T timesteps of BaselineLSTMNet.forward in one kernel invocation."""
    TB, D = xs_ref.shape                      # T*B rows, feature dim
    B, H = h0_ref.shape
    O = probs_ref.shape[-1]
    T = TB // B

    # ---- hoisted input path: lin1 MLP branch + outer ReLU, batched over all T*B rows
    a = xs_ref[...]                                                   # (T*B, D) f32
    for k in range(4):
        a = jnp.dot(a.astype(jnp.bfloat16), w_pack_ref[k],
                    preferred_element_type=jnp.float32) + b_pack_ref[k]
        a = jnp.maximum(a, 0.0)

    # ---- hoisted input contribution to the LSTM gates: a @ W_ih + (b_ih + b_hh)
    g_in = jnp.dot(a.astype(jnp.bfloat16), w_ih_ref[...],
                   preferred_element_type=jnp.float32) + b_lstm_ref[...]   # (T*B, 4H)

    # ---- recurrence: only h_prev @ W_hh + elementwise per step (fully unrolled, T small)
    w_hh = w_hh_ref[...]                                              # (H, 4H) bf16
    h = h0_ref[...]                                                   # (B, H) f32
    c = c0_ref[...]
    for t in range(T):
        gates = g_in[t * B:(t + 1) * B, :] + jnp.dot(
            h.astype(jnp.bfloat16), w_hh, preferred_element_type=jnp.float32)
        # PyTorch gate order [i, f, g, o]; tanh only on the g slice (EUP micro-opt).
        i_g = jax.nn.sigmoid(gates[:, 0 * H:1 * H])
        f_g = jax.nn.sigmoid(gates[:, 1 * H:2 * H])
        g_g = jnp.tanh(gates[:, 2 * H:3 * H])
        o_g = jax.nn.sigmoid(gates[:, 3 * H:4 * H])
        c = f_g * c + i_g * g_g
        h = o_g * jnp.tanh(c)
        h_hist_ref[t * B:(t + 1) * B, :] = h                          # save for deferred head
    h_out_ref[...] = h
    c_out_ref[...] = c

    # ---- deferred head: lin3(ReLU(lin2(ReLU(h_t)))) as two batched matmuls over T*B rows
    z = jnp.maximum(h_hist_ref[...], 0.0)
    z = jnp.dot(z.astype(jnp.bfloat16), w_pack_ref[4],
                preferred_element_type=jnp.float32) + b_pack_ref[4]
    z = jnp.maximum(z, 0.0)
    logits_full = jnp.dot(z.astype(jnp.bfloat16), w_pack_ref[5],
                          preferred_element_type=jnp.float32) + b_pack_ref[5]   # (T*B, D)

    # ---- per-timestep softmax over the FLATTENED (B*O,) logits.
    # NOTE: the (1,1) keepdims reductions intentionally reduce over BOTH batch and output
    # axes — this matches PyTorch's .view(-1) followed by Softmax(dim=0). Do not "fix"
    # into a per-row softmax. Exact reciprocal keeps sum-to-one within 1e-5.
    for t in range(T):
        blk = logits_full[t * B:(t + 1) * B, :O]                      # (B, O) valid lanes
        m = jnp.max(blk, keepdims=True)                               # (1, 1)
        e = jnp.exp(blk - m)
        s = jnp.sum(e, keepdims=True)                                 # (1, 1)
        probs_ref[t * B:(t + 1) * B, :] = e * pl.reciprocal(s, approx=False)


@functools.partial(jax.jit, static_argnames=("output_dim",))
def baseline_lstm_forward_seq(xs, hidden_state, packed, output_dim):
    """Run T sequential applications of BaselineLSTMNet.forward in ONE pallas_call.

    xs: (T, B, D) f32 ; hidden_state: tuple of (1, B, H) arrays (PyTorch layout).
    Returns (probs, hidden_out) with probs: (T, B*output_dim) (per-step .view(-1)
    softmax) and hidden_out in (1, B, H) PyTorch layout. Caller's hidden_state
    buffers are NOT donated.
    """
    h0 = hidden_state[0][0]                 # (B, H)
    c0 = hidden_state[1][0]                 # (B, H)
    T, B, D = xs.shape
    H = h0.shape[-1]
    O = output_dim

    xs_flat = xs.reshape(T * B, D)          # free host-side reshape (row-major)

    vmem = pl.BlockSpec(memory_space=pltpu.MemorySpace.VMEM)   # whole-array VMEM blocks
    probs_flat, h_fin, c_fin = pl.pallas_call(
        _forward_kernel,
        out_shape=(
            jax.ShapeDtypeStruct((T * B, O), jnp.float32),     # probs, written once
            jax.ShapeDtypeStruct((B, H), jnp.float32),         # final h
            jax.ShapeDtypeStruct((B, H), jnp.float32),         # final c
        ),
        in_specs=[vmem] * 8,
        out_specs=(vmem, vmem, vmem),
        scratch_shapes=[pltpu.VMEM((T * B, H), jnp.float32)],  # h_t history for the head
    )(xs_flat, h0, c0,
      packed["w_pack"], packed["b_pack"],
      packed["w_ih"], packed["w_hh"], packed["b_lstm"])

    probs = probs_flat.reshape(T, B * O)                       # per-step .view(-1)
    hidden_out = (h_fin[None, ...], c_fin[None, ...])          # back to (1, B, H)
    return probs, hidden_out


def baseline_lstm_forward(x, hidden_state, packed, output_dim):
    """Single-step forward matching the nn.Module signature: x (B, D)."""
    probs, hidden_out = baseline_lstm_forward_seq(x[None], hidden_state, packed,
                                                  output_dim)
    return probs[0], hidden_out


def pack_params(params):
    """Host-side packing: 16 tensors -> 5 buffers; matmul weights cast once to bf16."""
    D = params["w1a"].shape[0]
    O = params["w3"].shape[1]
    assert O <= D, "pack_params requires output_dim <= input_dim (lin3 lane padding)"
    w3_pad = jnp.zeros((D, D), jnp.float32).at[:, :O].set(params["w3"])
    b3_pad = jnp.zeros((1, D), jnp.float32).at[:, :O].set(params["b3"])
    w_pack = jnp.stack([params["w1a"], params["w1b"], params["w1c"],
                        params["w1d"], params["w2"], w3_pad]).astype(jnp.bfloat16)
    b_pack = jnp.stack([params["b1a"], params["b1b"], params["b1c"],
                        params["b1d"], params["b2"], b3_pad])                 # f32
    return {"w_pack": w_pack, "b_pack": b_pack,
            "w_ih": params["w_ih"].astype(jnp.bfloat16),                      # (D, 4H)
            "w_hh": params["w_hh"].astype(jnp.bfloat16),                      # (H, 4H)
            "b_lstm": params["b_ih"] + params["b_hh"]}                        # (1, 4H)


def init_params(key, input_dim, output_dim):
    """Deterministic synthetic parameters (shapes match the nn.Module __init__)."""
    D, H, O = input_dim, input_dim, output_dim
    keys = jax.random.split(key, 16)
    s = 0.1

    def lin(kw, kb, n_in, n_out):
        w = s * jax.random.normal(kw, (n_in, n_out), jnp.float32)   # (in, out) layout
        b = s * jax.random.normal(kb, (1, n_out), jnp.float32)
        return w, b

    p = {}
    p["w1a"], p["b1a"] = lin(keys[0], keys[1], D, D)
    p["w1b"], p["b1b"] = lin(keys[2], keys[3], D, D)
    p["w1c"], p["b1c"] = lin(keys[4], keys[5], D, D)
    p["w1d"], p["b1d"] = lin(keys[6], keys[7], D, D)
    # LSTM: PyTorch weight_ih_l0 is (4H, D) -> stored transposed (D, 4H); gates [i,f,g,o]
    p["w_ih"] = s * jax.random.normal(keys[8], (D, 4 * H), jnp.float32)
    p["w_hh"] = s * jax.random.normal(keys[9], (H, 4 * H), jnp.float32)
    p["b_ih"] = s * jax.random.normal(keys[10], (1, 4 * H), jnp.float32)
    p["b_hh"] = s * jax.random.normal(keys[11], (1, 4 * H), jnp.float32)
    p["w2"], p["b2"] = lin(keys[12], keys[13], H, D)
    p["w3"], p["b3"] = lin(keys[14], keys[15], D, O)
    return p


def reference_forward(x, hidden_state, params):
    """Pure-JAX f32 replica of BaselineLSTMNet.forward (is_value=False)."""
    h = hidden_state[0][0]
    c = hidden_state[1][0]
    a = x
    for wk, bk in (("w1a", "b1a"), ("w1b", "b1b"), ("w1c", "b1c"), ("w1d", "b1d")):
        a = jnp.maximum(a @ params[wk] + params[bk], 0.0)
    gates = a @ params["w_ih"] + params["b_ih"] + h @ params["w_hh"] + params["b_hh"]
    H = h.shape[-1]
    i = jax.nn.sigmoid(gates[:, 0 * H:1 * H])
    f = jax.nn.sigmoid(gates[:, 1 * H:2 * H])
    g = jnp.tanh(gates[:, 2 * H:3 * H])
    o = jax.nn.sigmoid(gates[:, 3 * H:4 * H])
    c1 = f * c + i * g
    h1 = o * jnp.tanh(c1)
    z = jnp.maximum(jnp.maximum(h1, 0.0) @ params["w2"] + params["b2"], 0.0)
    logits = (z @ params["w3"] + params["b3"]).reshape(-1)
    return jax.nn.softmax(logits, axis=0), (h1[None], c1[None])


if __name__ == "__main__":
    input_dim = 32      # > 10 -> lin1 is the 4-layer MLP branch
    output_dim = 4
    batch = 2
    seq = 8             # timesteps amortized in a single pallas_call

    key = jax.random.PRNGKey(0)
    k_param, k_x = jax.random.split(key)
    params = init_params(k_param, input_dim, output_dim)
    packed = pack_params(params)

    xs = jax.random.normal(k_x, (seq, batch, input_dim), jnp.float32)
    # init_hidden(batch): zeros of shape (num_layers=1, batch, hidden_dim)
    hidden = (jnp.zeros((1, batch, input_dim), jnp.float32),
              jnp.zeros((1, batch, input_dim), jnp.float32))

    # ---- multi-step (amortized) path: seq timesteps in one kernel launch
    probs_seq, (h_fin, c_fin) = baseline_lstm_forward_seq(xs, hidden, packed, output_dim)
    jax.block_until_ready((probs_seq, h_fin, c_fin))

    # ---- pure-JAX f32 reference: loop forward() seq times, carrying the state
    ref_probs = []
    ref_hidden = hidden
    for t in range(seq):
        p_t, ref_hidden = reference_forward(xs[t], ref_hidden, params)
        ref_probs.append(p_t)
    ref_probs = jnp.stack(ref_probs)

    assert probs_seq.shape == (seq, batch * output_dim)
    assert h_fin.shape == (1, batch, input_dim) and c_fin.shape == (1, batch, input_dim)
    # bf16 MXU matmuls vs f32 reference -> loose numerical tolerance
    assert float(jnp.max(jnp.abs(probs_seq - ref_probs))) < 2e-2
    assert float(jnp.max(jnp.abs(h_fin - ref_hidden[0]))) < 2e-2
    assert float(jnp.max(jnp.abs(c_fin - ref_hidden[1]))) < 2e-2
    # exact (approx=False) reciprocal keeps the flattened softmax sum-to-one tight
    assert float(jnp.max(jnp.abs(jnp.sum(probs_seq, axis=-1) - 1.0))) < 1e-5

    # ---- single-step path matching the original module forward signature
    probs1, (h1, c1) = baseline_lstm_forward(xs[0], hidden, packed, output_dim)
    jax.block_until_ready((probs1, h1, c1))
    assert probs1.shape == (batch * output_dim,)
    assert float(jnp.max(jnp.abs(probs1 - ref_probs[0]))) < 2e-2

    print("KERNEL_OK")
</pallas_src>

<mosaic_0001>
module attributes {stable_mosaic.version = 11 : i64} {
  func.func @_forward_kernel(%arg0: memref<16x32xf32, #tpu.memory_space<vmem>>, %arg1: memref<2x32xf32, #tpu.memory_space<vmem>>, %arg2: memref<2x32xf32, #tpu.memory_space<vmem>>, %arg3: memref<6x32x32xbf16, #tpu.memory_space<vmem>>, %arg4: memref<6x1x32xf32, #tpu.memory_space<vmem>>, %arg5: memref<32x128xbf16, #tpu.memory_space<vmem>>, %arg6: memref<32x128xbf16, #tpu.memory_space<vmem>>, %arg7: memref<1x128xf32, #tpu.memory_space<vmem>>, %arg8: memref<16x4xf32, #tpu.memory_space<vmem>>, %arg9: memref<2x32xf32, #tpu.memory_space<vmem>>, %arg10: memref<2x32xf32, #tpu.memory_space<vmem>>, %arg11: memref<16x32xf32, #tpu.memory_space<vmem>>) attributes {dimension_semantics = [], scalar_prefetch = 0 : i64, scratch_operands = 1 : i64, tpu.core_type = #tpu.core_type<tc>} {
    %c0 = arith.constant 0 : index
    %c0_0 = arith.constant 0 : index
    %0 = vector.load %arg0[%c0, %c0_0] : memref<16x32xf32, #tpu.memory_space<vmem>>, vector<16x32xf32>
    %1 = arith.truncf %0 : vector<16x32xf32> to vector<16x32xbf16>
    %c0_1 = arith.constant 0 : index
    %c0_2 = arith.constant 0 : index
    %c0_3 = arith.constant 0 : index
    %2 = vector.load %arg3[%c0_1, %c0_2, %c0_3] : memref<6x32x32xbf16, #tpu.memory_space<vmem>>, vector<1x32x32xbf16>
    %3 = vector.shape_cast %2 : vector<1x32x32xbf16> to vector<32x32xbf16>
    %cst = arith.constant dense<0.000000e+00> : vector<16x32xf32>
    %4 = tpu.matmul %1, %3, %cst {dimension_numbers = #tpu.dot_dimension_numbers<[1], [0], [0], [1], [0, 0, 1, 1], [], []>} : vector<16x32xbf16>, vector<32x32xbf16>, vector<16x32xf32> -> vector<16x32xf32>
    %c0_4 = arith.constant 0 : index
    %c0_5 = arith.constant 0 : index
    %c0_6 = arith.constant 0 : index
    %5 = vector.load %arg4[%c0_4, %c0_5, %c0_6] : memref<6x1x32xf32, #tpu.memory_space<vmem>>, vector<1x1x32xf32>
    %6 = vector.shape_cast %5 : vector<1x1x32xf32> to vector<1x32xf32>
    %7 = vector.broadcast %6 : vector<1x32xf32> to vector<16x32xf32>
    %8 = arith.addf %4, %7 : vector<16x32xf32>
    %cst_7 = arith.constant 0.000000e+00 : f32
    %9 = vector.broadcast %cst_7 : f32 to vector<16x32xf32>
    %10 = arith.maximumf %8, %9 : vector<16x32xf32>
    %11 = arith.truncf %10 : vector<16x32xf32> to vector<16x32xbf16>
    %c1 = arith.constant 1 : index
    %c0_8 = arith.constant 0 : index
    %c0_9 = arith.constant 0 : index
    %12 = vector.load %arg3[%c1, %c0_8, %c0_9] : memref<6x32x32xbf16, #tpu.memory_space<vmem>>, vector<1x32x32xbf16>
    %13 = vector.shape_cast %12 : vector<1x32x32xbf16> to vector<32x32xbf16>
    %cst_10 = arith.constant dense<0.000000e+00> : vector<16x32xf32>
    %14 = tpu.matmul %11, %13, %cst_10 {dimension_numbers = #tpu.dot_dimension_numbers<[1], [0], [0], [1], [0, 0, 1, 1], [], []>} : vector<16x32xbf16>, vector<32x32xbf16>, vector<16x32xf32> -> vector<16x32xf32>
    %c1_11 = arith.constant 1 : index
    %c0_12 = arith.constant 0 : index
    %c0_13 = arith.constant 0 : index
    %15 = vector.load %arg4[%c1_11, %c0_12, %c0_13] : memref<6x1x32xf32, #tpu.memory_space<vmem>>, vector<1x1x32xf32>
    %16 = vector.shape_cast %15 : vector<1x1x32xf32> to vector<1x32xf32>
    %17 = vector.broadcast %16 : vector<1x32xf32> to vector<16x32xf32>
    %18 = arith.addf %14, %17 : vector<16x32xf32>
    %cst_14 = arith.constant 0.000000e+00 : f32
    %19 = vector.broadcast %cst_14 : f32 to vector<16x32xf32>
    %20 = arith.maximumf %18, %19 : vector<16x32xf32>
    %21 = arith.truncf %20 : vector<16x32xf32> to vector<16x32xbf16>
    %c2 = arith.constant 2 : index
    %c0_15 = arith.constant 0 : index
    %c0_16 = arith.constant 0 : index
    %22 = vector.load %arg3[%c2, %c0_15, %c0_16] : memref<6x32x32xbf16, #tpu.memory_space<vmem>>, vector<1x32x32xbf16>
    %23 = vector.shape_cast %22 : vector<1x32x32xbf16> to vector<32x32xbf16>
    %cst_17 = arith.constant dense<0.000000e+00> : vector<16x32xf32>
    %24 = tpu.matmul %21, %23, %cst_17 {dimension_numbers = #tpu.dot_dimension_numbers<[1], [0], [0], [1], [0, 0, 1, 1], [], []>} : vector<16x32xbf16>, vector<32x32xbf16>, vector<16x32xf32> -> vector<16x32xf32>
    %c2_18 = arith.constant 2 : index
    %c0_19 = arith.constant 0 : index
    %c0_20 = arith.constant 0 : index
    %25 = vector.load %arg4[%c2_18, %c0_19, %c0_20] : memref<6x1x32xf32, #tpu.memory_space<vmem>>, vector<1x1x32xf32>
    %26 = vector.shape_cast %25 : vector<1x1x32xf32> to vector<1x32xf32>
    %27 = vector.broadcast %26 : vector<1x32xf32> to vector<16x32xf32>
    %28 = arith.addf %24, %27 : vector<16x32xf32>
    %cst_21 = arith.constant 0.000000e+00 : f32
    %29 = vector.broadcast %cst_21 : f32 to vector<16x32xf32>
    %30 = arith.maximumf %28, %29 : vector<16x32xf32>
    %31 = arith.truncf %30 : vector<16x32xf32> to vector<16x32xbf16>
    %c3 = arith.constant 3 : index
    %c0_22 = arith.constant 0 : index
    %c0_23 = arith.constant 0 : index
    %32 = vector.load %arg3[%c3, %c0_22, %c0_23] : memref<6x32x32xbf16, #tpu.memory_space<vmem>>, vector<1x32x32xbf16>
    %33 = vector.shape_cast %32 : vector<1x32x32xbf16> to vector<32x32xbf16>
    %cst_24 = arith.constant dense<0.000000e+00> : vector<16x32xf32>
    %34 = tpu.matmul %31, %33, %cst_24 {dimension_numbers = #tpu.dot_dimension_numbers<[1], [0], [0], [1], [0, 0, 1, 1], [], []>} : vector<16x32xbf16>, vector<32x32xbf16>, vector<16x32xf32> -> vector<16x32xf32>
    %c3_25 = arith.constant 3 : index
    %c0_26 = arith.constant 0 : index
    %c0_27 = arith.constant 0 : index
    %35 = vector.load %arg4[%c3_25, %c0_26, %c0_27] : memref<6x1x32xf32, #tpu.memory_space<vmem>>, vector<1x1x32xf32>
    %36 = vector.shape_cast %35 : vector<1x1x32xf32> to vector<1x32xf32>
    %37 = vector.broadcast %36 : vector<1x32xf32> to vector<16x32xf32>
    %38 = arith.addf %34, %37 : vector<16x32xf32>
    %cst_28 = arith.constant 0.000000e+00 : f32
    %39 = vector.broadcast %cst_28 : f32 to vector<16x32xf32>
    %40 = arith.maximumf %38, %39 : vector<16x32xf32>
    %41 = arith.truncf %40 : vector<16x32xf32> to vector<16x32xbf16>
    %c0_29 = arith.constant 0 : index
    %c0_30 = arith.constant 0 : index
    %42 = vector.load %arg5[%c0_29, %c0_30] : memref<32x128xbf16, #tpu.memory_space<vmem>>, vector<32x128xbf16>
    %cst_31 = arith.constant dense<0.000000e+00> : vector<16x128xf32>
    %43 = tpu.matmul %41, %42, %cst_31 {dimension_numbers = #tpu.dot_dimension_numbers<[1], [0], [0], [1], [0, 0, 1, 1], [], []>} : vector<16x32xbf16>, vector<32x128xbf16>, vector<16x128xf32> -> vector<16x128xf32>
    %c0_32 = arith.constant 0 : index
    %c0_33 = arith.constant 0 : index
    %44 = vector.load %arg7[%c0_32, %c0_33] : memref<1x128xf32, #tpu.memory_space<vmem>>, vector<1x128xf32>
    %45 = vector.broadcast %44 : vector<1x128xf32> to vector<16x128xf32>
    %46 = arith.addf %43, %45 : vector<16x128xf32>
    %c0_34 = arith.constant 0 : index
    %c0_35 = arith.constant 0 : index
    %47 = vector.load %arg6[%c0_34, %c0_35] : memref<32x128xbf16, #tpu.memory_space<vmem>>, vector<32x128xbf16>
    %c0_36 = arith.constant 0 : index
    %c0_37 = arith.constant 0 : index
    %48 = vector.load %arg1[%c0_36, %c0_37] : memref<2x32xf32, #tpu.memory_space<vmem>>, vector<2x32xf32>
    %c0_38 = arith.constant 0 : index
    %c0_39 = arith.constant 0 : index
    %49 = vector.load %arg2[%c0_38, %c0_39] : memref<2x32xf32, #tpu.memory_space<vmem>>, vector<2x32xf32>
    %50 = vector.extract_strided_slice %46 {offsets = [0, 0], sizes = [2, 128], strides = [1, 1]} : vector<16x128xf32> to vector<2x128xf32>
    %51 = arith.truncf %48 : vector<2x32xf32> to vector<2x32xbf16>
    %cst_40 = arith.constant dense<0.000000e+00> : vector<2x128xf32>
    %52 = tpu.matmul %51, %47, %cst_40 {dimension_numbers = #tpu.dot_dimension_numbers<[1], [0], [0], [1], [0, 0, 1, 1], [], []>} : vector<2x32xbf16>, vector<32x128xbf16>, vector<2x128xf32> -> vector<2x128xf32>
    %53 = arith.addf %50, %52 : vector<2x128xf32>
    %54 = vector.extract_strided_slice %53 {offsets = [0, 0], sizes = [2, 32], strides = [1, 1]} : vector<2x128xf32> to vector<2x32xf32>
    %55 = arith.negf %54 : vector<2x32xf32>
    %56 = math.exp %55 : vector<2x32xf32>
    %cst_41 = arith.constant 1.000000e+00 : f32
    %57 = vector.broadcast %cst_41 : f32 to vector<2x32xf32>
    %58 = arith.addf %57, %56 : vector<2x32xf32>
    %59 = arith.divf %57, %58 : vector<2x32xf32>
    %60 = vector.extract_strided_slice %53 {offsets = [0, 32], sizes = [2, 32], strides = [1, 1]} : vector<2x128xf32> to vector<2x32xf32>
    %61 = arith.negf %60 : vector<2x32xf32>
    %62 = math.exp %61 : vector<2x32xf32>
    %cst_42 = arith.constant 1.000000e+00 : f32
    %63 = vector.broadcast %cst_42 : f32 to vector<2x32xf32>
    %64 = arith.addf %63, %62 : vector<2x32xf32>
    %65 = arith.divf %63, %64 : vector<2x32xf32>
    %66 = vector.extract_strided_slice %53 {offsets = [0, 64], sizes = [2, 32], strides = [1, 1]} : vector<2x128xf32> to vector<2x32xf32>
    %67 = math.tanh %66 : vector<2x32xf32>
    %68 = vector.extract_strided_slice %53 {offsets = [0, 96], sizes = [2, 32], strides = [1, 1]} : vector<2x128xf32> to vector<2x32xf32>
    %69 = arith.negf %68 : vector<2x32xf32>
    %70 = math.exp %69 : vector<2x32xf32>
    %cst_43 = arith.constant 1.000000e+00 : f32
    %71 = vector.broadcast %cst_43 : f32 to vector<2x32xf32>
    %72 = arith.addf %71, %70 : vector<2x32xf32>
    %73 = arith.divf %71, %72 : vector<2x32xf32>
    %74 = arith.mulf %65, %49 : vector<2x32xf32>
    %75 = arith.mulf %59, %67 : vector<2x32xf32>
    %76 = arith.addf %74, %75 : vector<2x32xf32>
    %77 = math.tanh %76 : vector<2x32xf32>
    %78 = arith.mulf %73, %77 : vector<2x32xf32>
    %c0_44 = arith.constant 0 : index
    %c0_45 = arith.constant 0 : index
    %79 = vector.load %arg11[%c0_44, %c0_45] : memref<16x32xf32, #tpu.memory_space<vmem>>, vector<2x32xf32>
    tpu.vector_store %arg11[%c0_44, %c0_45], %78 {strides = array<i32>} : memref<16x32xf32, #tpu.memory_space<vmem>>, vector<2x32xf32>,
    %80 = vector.extract_strided_slice %46 {offsets = [2, 0], sizes = [2, 128], strides = [1, 1]} : vector<16x128xf32> to vector<2x128xf32>
    %81 = arith.truncf %78 : vector<2x32xf32> to vector<2x32xbf16>
    %cst_46 = arith.constant dense<0.000000e+00> : vector<2x128xf32>
    %82 = tpu.matmul %81, %47, %cst_46 {dimension_numbers = #tpu.dot_dimension_numbers<[1], [0], [0], [1], [0, 0, 1, 1], [], []>} : vector<2x32xbf16>, vector<32x128xbf16>, vector<2x128xf32> -> vector<2x128xf32>
    %83 = arith.addf %80, %82 : vector<2x128xf32>
    %84 = vector.extract_strided_slice %83 {offsets = [0, 0], sizes = [2, 32], strides = [1, 1]} : vector<2x128xf32> to vector<2x32xf32>
    %85 = arith.negf %84 : vector<2x32xf32>
    %86 = math.exp %85 : vector<2x32xf32>
    %cst_47 = arith.constant 1.000000e+00 : f32
    %87 = vector.broadcast %cst_47 : f32 to vector<2x32xf32>
    %88 = arith.addf %87, %86 : vector<2x32xf32>
    %89 = arith.divf %87, %88 : vector<2x32xf32>
    %90 = vector.extract_strided_slice %83 {offsets = [0, 32], sizes = [2, 32], strides = [1, 1]} : vector<2x128xf32> to vector<2x32xf32>
    %91 = arith.negf %90 : vector<2x32xf32>
    %92 = math.exp %91 : vector<2x32xf32>
    %cst_48 = arith.constant 1.000000e+00 : f32
    %93 = vector.broadcast %cst_48 : f32 to vector<2x32xf32>
    %94 = arith.addf %93, %92 : vector<2x32xf32>
    %95 = arith.divf %93, %94 : vector<2x32xf32>
    %96 = vector.extract_strided_slice %83 {offsets = [0, 64], sizes = [2, 32], strides = [1, 1]} : vector<2x128xf32> to vector<2x32xf32>
    %97 = math.tanh %96 : vector<2x32xf32>
    %98 = vector.extract_strided_slice %83 {offsets = [0, 96], sizes = [2, 32], strides = [1, 1]} : vector<2x128xf32> to vector<2x32xf32>
    %99 = arith.negf %98 : vector<2x32xf32>
    %100 = math.exp %99 : vector<2x32xf32>
    %cst_49 = arith.constant 1.000000e+00 : f32
    %101 = vector.broadcast %cst_49 : f32 to vector<2x32xf32>
    %102 = arith.addf %101, %100 : vector<2x32xf32>
    %103 = arith.divf %101, %102 : vector<2x32xf32>
    %104 = arith.mulf %95, %76 : vector<2x32xf32>
    %105 = arith.mulf %89, %97 : vector<2x32xf32>
    %106 = arith.addf %104, %105 : vector<2x32xf32>
    %107 = math.tanh %106 : vector<2x32xf32>
    %108 = arith.mulf %103, %107 : vector<2x32xf32>
    %c2_50 = arith.constant 2 : index
    %c0_51 = arith.constant 0 : index
    %109 = vector.load %arg11[%c2_50, %c0_51] : memref<16x32xf32, #tpu.memory_space<vmem>>, vector<2x32xf32>
    tpu.vector_store %arg11[%c2_50, %c0_51], %108 {strides = array<i32>} : memref<16x32xf32, #tpu.memory_space<vmem>>, vector<2x32xf32>,
    %110 = vector.extract_strided_slice %46 {offsets = [4, 0], sizes = [2, 128], strides = [1, 1]} : vector<16x128xf32> to vector<2x128xf32>
    %111 = arith.truncf %108 : vector<2x32xf32> to vector<2x32xbf16>
    %cst_52 = arith.constant dense<0.000000e+00> : vector<2x128xf32>
    %112 = tpu.matmul %111, %47, %cst_52 {dimension_numbers = #tpu.dot_dimension_numbers<[1], [0], [0], [1], [0, 0, 1, 1], [], []>} : vector<2x32xbf16>, vector<32x128xbf16>, vector<2x128xf32> -> vector<2x128xf32>
    %113 = arith.addf %110, %112 : vector<2x128xf32>
    %114 = vector.extract_strided_slice %113 {offsets = [0, 0], sizes = [2, 32], strides = [1, 1]} : vector<2x128xf32> to vector<2x32xf32>
    %115 = arith.negf %114 : vector<2x32xf32>
    %116 = math.exp %115 : vector<2x32xf32>
    %cst_53 = arith.constant 1.000000e+00 : f32
    %117 = vector.broadcast %cst_53 : f32 to vector<2x32xf32>
    %118 = arith.addf %117, %116 : vector<2x32xf32>
    %119 = arith.divf %117, %118 : vector<2x32xf32>
    %120 = vector.extract_strided_slice %113 {offsets = [0, 32], sizes = [2, 32], strides = [1, 1]} : vector<2x128xf32> to vector<2x32xf32>
    %121 = arith.negf %120 : vector<2x32xf32>
    %122 = math.exp %121 : vector<2x32xf32>
    %cst_54 = arith.constant 1.000000e+00 : f32
    %123 = vector.broadcast %cst_54 : f32 to vector<2x32xf32>
    %124 = arith.addf %123, %122 : vector<2x32xf32>
    %125 = arith.divf %123, %124 : vector<2x32xf32>
    %126 = vector.extract_strided_slice %113 {offsets = [0, 64], sizes = [2, 32], strides = [1, 1]} : vector<2x128xf32> to vector<2x32xf32>
    %127 = math.tanh %126 : vector<2x32xf32>
    %128 = vector.extract_strided_slice %113 {offsets = [0, 96], sizes = [2, 32], strides = [1, 1]} : vector<2x128xf32> to vector<2x32xf32>
    %129 = arith.negf %128 : vector<2x32xf32>
    %130 = math.exp %129 : vector<2x32xf32>
    %cst_55 = arith.constant 1.000000e+00 : f32
    %131 = vector.broadcast %cst_55 : f32 to vector<2x32xf32>
    %132 = arith.addf %131, %130 : vector<2x32xf32>
    %133 = arith.divf %131, %132 : vector<2x32xf32>
    %134 = arith.mulf %125, %106 : vector<2x32xf32>
    %135 = arith.mulf %119, %127 : vector<2x32xf32>
    %136 = arith.addf %134, %135 : vector<2x32xf32>
    %137 = math.tanh %136 : vector<2x32xf32>
    %138 = arith.mulf %133, %137 : vector<2x32xf32>
    %c4 = arith.constant 4 : index
    %c0_56 = arith.constant 0 : index
    %139 = vector.load %arg11[%c4, %c0_56] : memref<16x32xf32, #tpu.memory_space<vmem>>, vector<2x32xf32>
    tpu.vector_store %arg11[%c4, %c0_56], %138 {strides = array<i32>} : memref<16x32xf32, #tpu.memory_space<vmem>>, vector<2x32xf32>,
    %140 = vector.extract_strided_slice %46 {offsets = [6, 0], sizes = [2, 128], strides = [1, 1]} : vector<16x128xf32> to vector<2x128xf32>
    %141 = arith.truncf %138 : vector<2x32xf32> to vector<2x32xbf16>
    %cst_57 = arith.constant dense<0.000000e+00> : vector<2x128xf32>
    %142 = tpu.matmul %141, %47, %cst_57 {dimension_numbers = #tpu.dot_dimension_numbers<[1], [0], [0], [1], [0, 0, 1, 1], [], []>} : vector<2x32xbf16>, vector<32x128xbf16>, vector<2x128xf32> -> vector<2x128xf32>
    %143 = arith.addf %140, %142 : vector<2x128xf32>
    %144 = vector.extract_strided_slice %143 {offsets = [0, 0], sizes = [2, 32], strides = [1, 1]} : vector<2x128xf32> to vector<2x32xf32>
    %145 = arith.negf %144 : vector<2x32xf32>
    %146 = math.exp %145 : vector<2x32xf32>
    %cst_58 = arith.constant 1.000000e+00 : f32
    %147 = vector.broadcast %cst_58 : f32 to vector<2x32xf32>
    %148 = arith.addf %147, %146 : vector<2x32xf32>
    %149 = arith.divf %147, %148 : vector<2x32xf32>
    %150 = vector.extract_strided_slice %143 {offsets = [0, 32], sizes = [2, 32], strides = [1, 1]} : vector<2x128xf32> to vector<2x32xf32>
    %151 = arith.negf %150 : vector<2x32xf32>
    %152 = math.exp %151 : vector<2x32xf32>
    %cst_59 = arith.constant 1.000000e+00 : f32
    %153 = vector.broadcast %cst_59 : f32 to vector<2x32xf32>
    %154 = arith.addf %153, %152 : vector<2x32xf32>
    %155 = arith.divf %153, %154 : vector<2x32xf32>
    %156 = vector.extract_strided_slice %143 {offsets = [0, 64], sizes = [2, 32], strides = [1, 1]} : vector<2x128xf32> to vector<2x32xf32>
    %157 = math.tanh %156 : vector<2x32xf32>
    %158 = vector.extract_strided_slice %143 {offsets = [0, 96], sizes = [2, 32], strides = [1, 1]} : vector<2x128xf32> to vector<2x32xf32>
    %159 = arith.negf %158 : vector<2x32xf32>
    %160 = math.exp %159 : vector<2x32xf32>
    %cst_60 = arith.constant 1.000000e+00 : f32
    %161 = vector.broadcast %cst_60 : f32 to vector<2x32xf32>
    %162 = arith.addf %161, %160 : vector<2x32xf32>
    %163 = arith.divf %161, %162 : vector<2x32xf32>
    %164 = arith.mulf %155, %136 : vector<2x32xf32>
    %165 = arith.mulf %149, %157 : vector<2x32xf32>
    %166 = arith.addf %164, %165 : vector<2x32xf32>
    %167 = math.tanh %166 : vector<2x32xf32>
    %168 = arith.mulf %163, %167 : vector<2x32xf32>
    %c6 = arith.constant 6 : index
    %c0_61 = arith.constant 0 : index
    %169 = vector.load %arg11[%c6, %c0_61] : memref<16x32xf32, #tpu.memory_space<vmem>>, vector<2x32xf32>
    tpu.vector_store %arg11[%c6, %c0_61], %168 {strides = array<i32>} : memref<16x32xf32, #tpu.memory_space<vmem>>, vector<2x32xf32>,
    %170 = vector.extract_strided_slice %46 {offsets = [8, 0], sizes = [2, 128], strides = [1, 1]} : vector<16x128xf32> to vector<2x128xf32>
    %171 = arith.truncf %168 : vector<2x32xf32> to vector<2x32xbf16>
    %cst_62 = arith.constant dense<0.000000e+00> : vector<2x128xf32>
    %172 = tpu.matmul %171, %47, %cst_62 {dimension_numbers = #tpu.dot_dimension_numbers<[1], [0], [0], [1], [0, 0, 1, 1], [], []>} : vector<2x32xbf16>, vector<32x128xbf16>, vector<2x128xf32> -> vector<2x128xf32>
    %173 = arith.addf %170, %172 : vector<2x128xf32>
    %174 = vector.extract_strided_slice %173 {offsets = [0, 0], sizes = [2, 32], strides = [1, 1]} : vector<2x128xf32> to vector<2x32xf32>
    %175 = arith.negf %174 : vector<2x32xf32>
    %176 = math.exp %175 : vector<2x32xf32>
    %cst_63 = arith.constant 1.000000e+00 : f32
    %177 = vector.broadcast %cst_63 : f32 to vector<2x32xf32>
    %178 = arith.addf %177, %176 : vector<2x32xf32>
    %179 = arith.divf %177, %178 : vector<2x32xf32>
    %180 = vector.extract_strided_slice %173 {offsets = [0, 32], sizes = [2, 32], strides = [1, 1]} : vector<2x128xf32> to vector<2x32xf32>
    %181 = arith.negf %180 : vector<2x32xf32>
    %182 = math.exp %181 : vector<2x32xf32>
    %cst_64 = arith.constant 1.000000e+00 : f32
    %183 = vector.broadcast %cst_64 : f32 to vector<2x32xf32>
    %184 = arith.addf %183, %182 : vector<2x32xf32>
    %185 = arith.divf %183, %184 : vector<2x32xf32>
    %186 = vector.extract_strided_slice %173 {offsets = [0, 64], sizes = [2, 32], strides = [1, 1]} : vector<2x128xf32> to vector<2x32xf32>
    %187 = math.tanh %186 : vector<2x32xf32>
    %188 = vector.extract_strided_slice %173 {offsets = [0, 96], sizes = [2, 32], strides = [1, 1]} : vector<2x128xf32> to vector<2x32xf32>
    %189 = arith.negf %188 : vector<2x32xf32>
    %190 = math.exp %189 : vector<2x32xf32>
    %cst_65 = arith.constant 1.000000e+00 : f32
    %191 = vector.broadcast %cst_65 : f32 to vector<2x32xf32>
    %192 = arith.addf %191, %190 : vector<2x32xf32>
    %193 = arith.divf %191, %192 : vector<2x32xf32>
    %194 = arith.mulf %185, %166 : vector<2x32xf32>
    %195 = arith.mulf %179, %187 : vector<2x32xf32>
    %196 = arith.addf %194, %195 : vector<2x32xf32>
    %197 = math.tanh %196 : vector<2x32xf32>
    %198 = arith.mulf %193, %197 : vector<2x32xf32>
    %c8 = arith.constant 8 : index
    %c0_66 = arith.constant 0 : index
    %199 = vector.load %arg11[%c8, %c0_66] : memref<16x32xf32, #tpu.memory_space<vmem>>, vector<2x32xf32>
    tpu.vector_store %arg11[%c8, %c0_66], %198 {strides = array<i32>} : memref<16x32xf32, #tpu.memory_space<vmem>>, vector<2x32xf32>,
    %200 = vector.extract_strided_slice %46 {offsets = [10, 0], sizes = [2, 128], strides = [1, 1]} : vector<16x128xf32> to vector<2x128xf32>
    %201 = arith.truncf %198 : vector<2x32xf32> to vector<2x32xbf16>
    %cst_67 = arith.constant dense<0.000000e+00> : vector<2x128xf32>
    %202 = tpu.matmul %201, %47, %cst_67 {dimension_numbers = #tpu.dot_dimension_numbers<[1], [0], [0], [1], [0, 0, 1, 1], [], []>} : vector<2x32xbf16>, vector<32x128xbf16>, vector<2x128xf32> -> vector<2x128xf32>
    %203 = arith.addf %200, %202 : vector<2x128xf32>
    %204 = vector.extract_strided_slice %203 {offsets = [0, 0], sizes = [2, 32], strides = [1, 1]} : vector<2x128xf32> to vector<2x32xf32>
    %205 = arith.negf %204 : vector<2x32xf32>
    %206 = math.exp %205 : vector<2x32xf32>
    %cst_68 = arith.constant 1.000000e+00 : f32
    %207 = vector.broadcast %cst_68 : f32 to vector<2x32xf32>
    %208 = arith.addf %207, %206 : vector<2x32xf32>
    %209 = arith.divf %207, %208 : vector<2x32xf32>
    %210 = vector.extract_strided_slice %203 {offsets = [0, 32], sizes = [2, 32], strides = [1, 1]} : vector<2x128xf32> to vector<2x32xf32>
    %211 = arith.negf %210 : vector<2x32xf32>
    %212 = math.exp %211 : vector<2x32xf32>
    %cst_69 = arith.constant 1.000000e+00 : f32
    %213 = vector.broadcast %cst_69 : f32 to vector<2x32xf32>
    %214 = arith.addf %213, %212 : vector<2x32xf32>
    %215 = arith.divf %213, %214 : vector<2x32xf32>
    %216 = vector.extract_strided_slice %203 {offsets = [0, 64], sizes = [2, 32], strides = [1, 1]} : vector<2x128xf32> to vector<2x32xf32>
    %217 = math.tanh %216 : vector<2x32xf32>
    %218 = vector.extract_strided_slice %203 {offsets = [0, 96], sizes = [2, 32], strides = [1, 1]} : vector<2x128xf32> to vector<2x32xf32>
    %219 = arith.negf %218 : vector<2x32xf32>
    %220 = math.exp %219 : vector<2x32xf32>
    %cst_70 = arith.constant 1.000000e+00 : f32
    %221 = vector.broadcast %cst_70 : f32 to vector<2x32xf32>
    %222 = arith.addf %221, %220 : vector<2x32xf32>
    %223 = arith.divf %221, %222 : vector<2x32xf32>
    %224 = arith.mulf %215, %196 : vector<2x32xf32>
    %225 = arith.mulf %209, %217 : vector<2x32xf32>
    %226 = arith.addf %224, %225 : vector<2x32xf32>
    %227 = math.tanh %226 : vector<2x32xf32>
    %228 = arith.mulf %223, %227 : vector<2x32xf32>
    %c10 = arith.constant 10 : index
    %c0_71 = arith.constant 0 : index
    %229 = vector.load %arg11[%c10, %c0_71] : memref<16x32xf32, #tpu.memory_space<vmem>>, vector<2x32xf32>
    tpu.vector_store %arg11[%c10, %c0_71], %228 {strides = array<i32>} : memref<16x32xf32, #tpu.memory_space<vmem>>, vector<2x32xf32>,
    %230 = vector.extract_strided_slice %46 {offsets = [12, 0], sizes = [2, 128], strides = [1, 1]} : vector<16x128xf32> to vector<2x128xf32>
    %231 = arith.truncf %228 : vector<2x32xf32> to vector<2x32xbf16>
    %cst_72 = arith.constant dense<0.000000e+00> : vector<2x128xf32>
    %232 = tpu.matmul %231, %47, %cst_72 {dimension_numbers = #tpu.dot_dimension_numbers<[1], [0], [0], [1], [0, 0, 1, 1], [], []>} : vector<2x32xbf16>, vector<32x128xbf16>, vector<2x128xf32> -> vector<2x128xf32>
    %233 = arith.addf %230, %232 : vector<2x128xf32>
    %234 = vector.extract_strided_slice %233 {offsets = [0, 0], sizes = [2, 32], strides = [1, 1]} : vector<2x128xf32> to vector<2x32xf32>
    %235 = arith.negf %234 : vector<2x32xf32>
    %236 = math.exp %235 : vector<2x32xf32>
    %cst_73 = arith.constant 1.000000e+00 : f32
    %237 = vector.broadcast %cst_73 : f32 to vector<2x32xf32>
    %238 = arith.addf %237, %236 : vector<2x32xf32>
    %239 = arith.divf %237, %238 : vector<2x32xf32>
    %240 = vector.extract_strided_slice %233 {offsets = [0, 32], sizes = [2, 32], strides = [1, 1]} : vector<2x128xf32> to vector<2x32xf32>
    %241 = arith.negf %240 : vector<2x32xf32>
    %242 = math.exp %241 : vector<2x32xf32>
    %cst_74 = arith.constant 1.000000e+00 : f32
    %243 = vector.broadcast %cst_74 : f32 to vector<2x32xf32>
    %244 = arith.addf %243, %242 : vector<2x32xf32>
    %245 = arith.divf %243, %244 : vector<2x32xf32>
    %246 = vector.extract_strided_slice %233 {offsets = [0, 64], sizes = [2, 32], strides = [1, 1]} : vector<2x128xf32> to vector<2x32xf32>
    %247 = math.tanh %246 : vector<2x32xf32>
    %248 = vector.extract_strided_slice %233 {offsets = [0, 96], sizes = [2, 32], strides = [1, 1]} : vector<2x128xf32> to vector<2x32xf32>
    %249 = arith.negf %248 : vector<2x32xf32>
    %250 = math.exp %249 : vector<2x32xf32>
    %cst_75 = arith.constant 1.000000e+00 : f32
    %251 = vector.broadcast %cst_75 : f32 to vector<2x32xf32>
    %252 = arith.addf %251, %250 : vector<2x32xf32>
    %253 = arith.divf %251, %252 : vector<2x32xf32>
    %254 = arith.mulf %245, %226 : vector<2x32xf32>
    %255 = arith.mulf %239, %247 : vector<2x32xf32>
    %256 = arith.addf %254, %255 : vector<2x32xf32>
    %257 = math.tanh %256 : vector<2x32xf32>
    %258 = arith.mulf %253, %257 : vector<2x32xf32>
    %c12 = arith.constant 12 : index
    %c0_76 = arith.constant 0 : index
    %259 = vector.load %arg11[%c12, %c0_76] : memref<16x32xf32, #tpu.memory_space<vmem>>, vector<2x32xf32>
    tpu.vector_store %arg11[%c12, %c0_76], %258 {strides = array<i32>} : memref<16x32xf32, #tpu.memory_space<vmem>>, vector<2x32xf32>,
    %260 = vector.extract_strided_slice %46 {offsets = [14, 0], sizes = [2, 128], strides = [1, 1]} : vector<16x128xf32> to vector<2x128xf32>
    %261 = arith.truncf %258 : vector<2x32xf32> to vector<2x32xbf16>
    %cst_77 = arith.constant dense<0.000000e+00> : vector<2x128xf32>
    %262 = tpu.matmul %261, %47, %cst_77 {dimension_numbers = #tpu.dot_dimension_numbers<[1], [0], [0], [1], [0, 0, 1, 1], [], []>} : vector<2x32xbf16>, vector<32x128xbf16>, vector<2x128xf32> -> vector<2x128xf32>
    %263 = arith.addf %260, %262 : vector<2x128xf32>
    %264 = vector.extract_strided_slice %263 {offsets = [0, 0], sizes = [2, 32], strides = [1, 1]} : vector<2x128xf32> to vector<2x32xf32>
    %265 = arith.negf %264 : vector<2x32xf32>
    %266 = math.exp %265 : vector<2x32xf32>
    %cst_78 = arith.constant 1.000000e+00 : f32
    %267 = vector.broadcast %cst_78 : f32 to vector<2x32xf32>
    %268 = arith.addf %267, %266 : vector<2x32xf32>
    %269 = arith.divf %267, %268 : vector<2x32xf32>
    %270 = vector.extract_strided_slice %263 {offsets = [0, 32], sizes = [2, 32], strides = [1, 1]} : vector<2x128xf32> to vector<2x32xf32>
    %271 = arith.negf %270 : vector<2x32xf32>
    %272 = math.exp %271 : vector<2x32xf32>
    %cst_79 = arith.constant 1.000000e+00 : f32
    %273 = vector.broadcast %cst_79 : f32 to vector<2x32xf32>
    %274 = arith.addf %273, %272 : vector<2x32xf32>
    %275 = arith.divf %273, %274 : vector<2x32xf32>
    %276 = vector.extract_strided_slice %263 {offsets = [0, 64], sizes = [2, 32], strides = [1, 1]} : vector<2x128xf32> to vector<2x32xf32>
    %277 = math.tanh %276 : vector<2x32xf32>
    %278 = vector.extract_strided_slice %263 {offsets = [0, 96], sizes = [2, 32], strides = [1, 1]} : vector<2x128xf32> to vector<2x32xf32>
    %279 = arith.negf %278 : vector<2x32xf32>
    %280 = math.exp %279 : vector<2x32xf32>
    %cst_80 = arith.constant 1.000000e+00 : f32
    %281 = vector.broadcast %cst_80 : f32 to vector<2x32xf32>
    %282 = arith.addf %281, %280 : vector<2x32xf32>
    %283 = arith.divf %281, %282 : vector<2x32xf32>
    %284 = arith.mulf %275, %256 : vector<2x32xf32>
    %285 = arith.mulf %269, %277 : vector<2x32xf32>
    %286 = arith.addf %284, %285 : vector<2x32xf32>
    %287 = math.tanh %286 : vector<2x32xf32>
    %288 = arith.mulf %283, %287 : vector<2x32xf32>
    %c14 = arith.constant 14 : index
    %c0_81 = arith.constant 0 : index
    %289 = vector.load %arg11[%c14, %c0_81] : memref<16x32xf32, #tpu.memory_space<vmem>>, vector<2x32xf32>
    tpu.vector_store %arg11[%c14, %c0_81], %288 {strides = array<i32>} : memref<16x32xf32, #tpu.memory_space<vmem>>, vector<2x32xf32>,
    %c0_82 = arith.constant 0 : index
    %c0_83 = arith.constant 0 : index
    %290 = vector.load %arg9[%c0_82, %c0_83] : memref<2x32xf32, #tpu.memory_space<vmem>>, vector<2x32xf32>
    tpu.vector_store %arg9[%c0_82, %c0_83], %288 {strides = array<i32>} : memref<2x32xf32, #tpu.memory_space<vmem>>, vector<2x32xf32>,
    %c0_84 = arith.constant 0 : index
    %c0_85 = arith.constant 0 : index
    %291 = vector.load %arg10[%c0_84, %c0_85] : memref<2x32xf32, #tpu.memory_space<vmem>>, vector<2x32xf32>
    tpu.vector_store %arg10[%c0_84, %c0_85], %286 {strides = array<i32>} : memref<2x32xf32, #tpu.memory_space<vmem>>, vector<2x32xf32>,
    %c0_86 = arith.constant 0 : index
    %c0_87 = arith.constant 0 : index
    %292 = vector.load %arg11[%c0_86, %c0_87] : memref<16x32xf32, #tpu.memory_space<vmem>>, vector<16x32xf32>
    %cst_88 = arith.constant 0.000000e+00 : f32
    %293 = vector.broadcast %cst_88 : f32 to vector<16x32xf32>
    %294 = arith.maximumf %292, %293 : vector<16x32xf32>
    %295 = arith.truncf %294 : vector<16x32xf32> to vector<16x32xbf16>
    %c4_89 = arith.constant 4 : index
    %c0_90 = arith.constant 0 : index
    %c0_91 = arith.constant 0 : index
    %296 = vector.load %arg3[%c4_89, %c0_90, %c0_91] : memref<6x32x32xbf16, #tpu.memory_space<vmem>>, vector<1x32x32xbf16>
    %297 = vector.shape_cast %296 : vector<1x32x32xbf16> to vector<32x32xbf16>
    %cst_92 = arith.constant dense<0.000000e+00> : vector<16x32xf32>
    %298 = tpu.matmul %295, %297, %cst_92 {dimension_numbers = #tpu.dot_dimension_numbers<[1], [0], [0], [1], [0, 0, 1, 1], [], []>} : vector<16x32xbf16>, vector<32x32xbf16>, vector<16x32xf32> -> vector<16x32xf32>
    %c4_93 = arith.constant 4 : index
    %c0_94 = arith.constant 0 : index
    %c0_95 = arith.constant 0 : index
    %299 = vector.load %arg4[%c4_93, %c0_94, %c0_95] : memref<6x1x32xf32, #tpu.memory_space<vmem>>, vector<1x1x32xf32>
    %300 = vector.shape_cast %299 : vector<1x1x32xf32> to vector<1x32xf32>
    %301 = vector.broadcast %300 : vector<1x32xf32> to vector<16x32xf32>
    %302 = arith.addf %298, %301 : vector<16x32xf32>
    %cst_96 = arith.constant 0.000000e+00 : f32
    %303 = vector.broadcast %cst_96 : f32 to vector<16x32xf32>
    %304 = arith.maximumf %302, %303 : vector<16x32xf32>
    %305 = arith.truncf %304 : vector<16x32xf32> to vector<16x32xbf16>
    %c5 = arith.constant 5 : index
    %c0_97 = arith.constant 0 : index
    %c0_98 = arith.constant 0 : index
    %306 = vector.load %arg3[%c5, %c0_97, %c0_98] : memref<6x32x32xbf16, #tpu.memory_space<vmem>>, vector<1x32x32xbf16>
    %307 = vector.shape_cast %306 : vector<1x32x32xbf16> to vector<32x32xbf16>
    %cst_99 = arith.constant dense<0.000000e+00> : vector<16x32xf32>
    %308 = tpu.matmul %305, %307, %cst_99 {dimension_numbers = #tpu.dot_dimension_numbers<[1], [0], [0], [1], [0, 0, 1, 1], [], []>} : vector<16x32xbf16>, vector<32x32xbf16>, vector<16x32xf32> -> vector<16x32xf32>
    %c5_100 = arith.constant 5 : index
    %c0_101 = arith.constant 0 : index
    %c0_102 = arith.constant 0 : index
    %309 = vector.load %arg4[%c5_100, %c0_101, %c0_102] : memref<6x1x32xf32, #tpu.memory_space<vmem>>, vector<1x1x32xf32>
    %310 = vector.shape_cast %309 : vector<1x1x32xf32> to vector<1x32xf32>
    %311 = vector.broadcast %310 : vector<1x32xf32> to vector<16x32xf32>
    %312 = arith.addf %308, %311 : vector<16x32xf32>
    %313 = vector.extract_strided_slice %312 {offsets = [0, 0], sizes = [2, 4], strides = [1, 1]} : vector<16x32xf32> to vector<2x4xf32>
    %314 = vector.shape_cast %313 : vector<2x4xf32> to vector<1x2x4xf32>
    %cst_103 = arith.constant dense<0xFF800000> : vector<1xf32>
    %315 = vector.multi_reduction <maximumf>, %314, %cst_103 [1, 2] : vector<1x2x4xf32> to vector<1xf32>
    %316 = vector.shape_cast %315 : vector<1xf32> to vector<1x1x1xf32>
    %317 = vector.extract %316[0, 0, 0] : f32 from vector<1x1x1xf32>
    %318 = vector.broadcast %317 : f32 to vector<1x1xf32>
    %319 = vector.broadcast %318 : vector<1x1xf32> to vector<2x4xf32>
    %320 = arith.subf %313, %319 : vector<2x4xf32>
    %321 = math.exp %320 : vector<2x4xf32>
    %322 = vector.shape_cast %321 : vector<2x4xf32> to vector<1x2x4xf32>
    %cst_104 = arith.constant dense<0.000000e+00> : vector<1xf32>
    %323 = vector.multi_reduction <add>, %322, %cst_104 [1, 2] : vector<1x2x4xf32> to vector<1xf32>
    %324 = vector.shape_cast %323 : vector<1xf32> to vector<1x1x1xf32>
    %325 = vector.extract %324[0, 0, 0] : f32 from vector<1x1x1xf32>
    %326 = vector.broadcast %325 : f32 to vector<1x1xf32>
    %327 = tpu.reciprocal %326 : vector<1x1xf32> -> vector<1x1xf32>
    %328 = vector.broadcast %327 : vector<1x1xf32> to vector<2x4xf32>
    %329 = arith.mulf %321, %328 : vector<2x4xf32>
    %c0_105 = arith.constant 0 : index
    %c0_106 = arith.constant 0 : index
    %330 = vector.load %arg8[%c0_105, %c0_106] : memref<16x4xf32, #tpu.memory_space<vmem>>, vector<2x4xf32>
    tpu.vector_store %arg8[%c0_105, %c0_106], %329 {strides = array<i32>} : memref<16x4xf32, #tpu.memory_space<vmem>>, vector<2x4xf32>,
    %331 = vector.extract_strided_slice %312 {offsets = [2, 0], sizes = [2, 4], strides = [1, 1]} : vector<16x32xf32> to vector<2x4xf32>
    %332 = vector.shape_cast %331 : vector<2x4xf32> to vector<1x2x4xf32>
    %cst_107 = arith.constant dense<0xFF800000> : vector<1xf32>
    %333 = vector.multi_reduction <maximumf>, %332, %cst_107 [1, 2] : vector<1x2x4xf32> to vector<1xf32>
    %334 = vector.shape_cast %333 : vector<1xf32> to vector<1x1x1xf32>
    %335 = vector.extract %334[0, 0, 0] : f32 from vector<1x1x1xf32>
    %336 = vector.broadcast %335 : f32 to vector<1x1xf32>
    %337 = vector.broadcast %336 : vector<1x1xf32> to vector<2x4xf32>
    %338 = arith.subf %331, %337 : vector<2x4xf32>
    %339 = math.exp %338 : vector<2x4xf32>
    %340 = vector.shape_cast %339 : vector<2x4xf32> to vector<1x2x4xf32>
    %cst_108 = arith.constant dense<0.000000e+00> : vector<1xf32>
    %341 = vector.multi_reduction <add>, %340, %cst_108 [1, 2] : vector<1x2x4xf32> to vector<1xf32>
    %342 = vector.shape_cast %341 : vector<1xf32> to vector<1x1x1xf32>
    %343 = vector.extract %342[0, 0, 0] : f32 from vector<1x1x1xf32>
    %344 = vector.broadcast %343 : f32 to vector<1x1xf32>
    %345 = tpu.reciprocal %344 : vector<1x1xf32> -> vector<1x1xf32>
    %346 = vector.broadcast %345 : vector<1x1xf32> to vector<2x4xf32>
    %347 = arith.mulf %339, %346 : vector<2x4xf32>
    %c2_109 = arith.constant 2 : index
    %c0_110 = arith.constant 0 : index
    %348 = vector.load %arg8[%c2_109, %c0_110] : memref<16x4xf32, #tpu.memory_space<vmem>>, vector<2x4xf32>
    tpu.vector_store %arg8[%c2_109, %c0_110], %347 {strides = array<i32>} : memref<16x4xf32, #tpu.memory_space<vmem>>, vector<2x4xf32>,
    %349 = vector.extract_strided_slice %312 {offsets = [4, 0], sizes = [2, 4], strides = [1, 1]} : vector<16x32xf32> to vector<2x4xf32>
    %350 = vector.shape_cast %349 : vector<2x4xf32> to vector<1x2x4xf32>
    %cst_111 = arith.constant dense<0xFF800000> : vector<1xf32>
    %351 = vector.multi_reduction <maximumf>, %350, %cst_111 [1, 2] : vector<1x2x4xf32> to vector<1xf32>
    %352 = vector.shape_cast %351 : vector<1xf32> to vector<1x1x1xf32>
    %353 = vector.extract %352[0, 0, 0] : f32 from vector<1x1x1xf32>
    %354 = vector.broadcast %353 : f32 to vector<1x1xf32>
    %355 = vector.broadcast %354 : vector<1x1xf32> to vector<2x4xf32>
    %356 = arith.subf %349, %355 : vector<2x4xf32>
    %357 = math.exp %356 : vector<2x4xf32>
    %358 = vector.shape_cast %357 : vector<2x4xf32> to vector<1x2x4xf32>
    %cst_112 = arith.constant dense<0.000000e+00> : vector<1xf32>
    %359 = vector.multi_reduction <add>, %358, %cst_112 [1, 2] : vector<1x2x4xf32> to vector<1xf32>
    %360 = vector.shape_cast %359 : vector<1xf32> to vector<1x1x1xf32>
    %361 = vector.extract %360[0, 0, 0] : f32 from vector<1x1x1xf32>
    %362 = vector.broadcast %361 : f32 to vector<1x1xf32>
    %363 = tpu.reciprocal %362 : vector<1x1xf32> -> vector<1x1xf32>
    %364 = vector.broadcast %363 : vector<1x1xf32> to vector<2x4xf32>
    %365 = arith.mulf %357, %364 : vector<2x4xf32>
    %c4_113 = arith.constant 4 : index
    %c0_114 = arith.constant 0 : index
    %366 = vector.load %arg8[%c4_113, %c0_114] : memref<16x4xf32, #tpu.memory_space<vmem>>, vector<2x4xf32>
    tpu.vector_store %arg8[%c4_113, %c0_114], %365 {strides = array<i32>} : memref<16x4xf32, #tpu.memory_space<vmem>>, vector<2x4xf32>,
    %367 = vector.extract_strided_slice %312 {offsets = [6, 0], sizes = [2, 4], strides = [1, 1]} : vector<16x32xf32> to vector<2x4xf32>
    %368 = vector.shape_cast %367 : vector<2x4xf32> to vector<1x2x4xf32>
    %cst_115 = arith.constant dense<0xFF800000> : vector<1xf32>
    %369 = vector.multi_reduction <maximumf>, %368, %cst_115 [1, 2] : vector<1x2x4xf32> to vector<1xf32>
    %370 = vector.shape_cast %369 : vector<1xf32> to vector<1x1x1xf32>
    %371 = vector.extract %370[0, 0, 0] : f32 from vector<1x1x1xf32>
    %372 = vector.broadcast %371 : f32 to vector<1x1xf32>
    %373 = vector.broadcast %372 : vector<1x1xf32> to vector<2x4xf32>
    %374 = arith.subf %367, %373 : vector<2x4xf32>
    %375 = math.exp %374 : vector<2x4xf32>
    %376 = vector.shape_cast %375 : vector<2x4xf32> to vector<1x2x4xf32>
    %cst_116 = arith.constant dense<0.000000e+00> : vector<1xf32>
    %377 = vector.multi_reduction <add>, %376, %cst_116 [1, 2] : vector<1x2x4xf32> to vector<1xf32>
    %378 = vector.shape_cast %377 : vector<1xf32> to vector<1x1x1xf32>
    %379 = vector.extract %378[0, 0, 0] : f32 from vector<1x1x1xf32>
    %380 = vector.broadcast %379 : f32 to vector<1x1xf32>
    %381 = tpu.reciprocal %380 : vector<1x1xf32> -> vector<1x1xf32>
    %382 = vector.broadcast %381 : vector<1x1xf32> to vector<2x4xf32>
    %383 = arith.mulf %375, %382 : vector<2x4xf32>
    %c6_117 = arith.constant 6 : index
    %c0_118 = arith.constant 0 : index
    %384 = vector.load %arg8[%c6_117, %c0_118] : memref<16x4xf32, #tpu.memory_space<vmem>>, vector<2x4xf32>
    tpu.vector_store %arg8[%c6_117, %c0_118], %383 {strides = array<i32>} : memref<16x4xf32, #tpu.memory_space<vmem>>, vector<2x4xf32>,
    %385 = vector.extract_strided_slice %312 {offsets = [8, 0], sizes = [2, 4], strides = [1, 1]} : vector<16x32xf32> to vector<2x4xf32>
    %386 = vector.shape_cast %385 : vector<2x4xf32> to vector<1x2x4xf32>
    %cst_119 = arith.constant dense<0xFF800000> : vector<1xf32>
    %387 = vector.multi_reduction <maximumf>, %386, %cst_119 [1, 2] : vector<1x2x4xf32> to vector<1xf32>
    %388 = vector.shape_cast %387 : vector<1xf32> to vector<1x1x1xf32>
    %389 = vector.extract %388[0, 0, 0] : f32 from vector<1x1x1xf32>
    %390 = vector.broadcast %389 : f32 to vector<1x1xf32>
    %391 = vector.broadcast %390 : vector<1x1xf32> to vector<2x4xf32>
    %392 = arith.subf %385, %391 : vector<2x4xf32>
    %393 = math.exp %392 : vector<2x4xf32>
    %394 = vector.shape_cast %393 : vector<2x4xf32> to vector<1x2x4xf32>
    %cst_120 = arith.constant dense<0.000000e+00> : vector<1xf32>
    %395 = vector.multi_reduction <add>, %394, %cst_120 [1, 2] : vector<1x2x4xf32> to vector<1xf32>
    %396 = vector.shape_cast %395 : vector<1xf32> to vector<1x1x1xf32>
    %397 = vector.extract %396[0, 0, 0] : f32 from vector<1x1x1xf32>
    %398 = vector.broadcast %397 : f32 to vector<1x1xf32>
    %399 = tpu.reciprocal %398 : vector<1x1xf32> -> vector<1x1xf32>
    %400 = vector.broadcast %399 : vector<1x1xf32> to vector<2x4xf32>
    %401 = arith.mulf %393, %400 : vector<2x4xf32>
    %c8_121 = arith.constant 8 : index
    %c0_122 = arith.constant 0 : index
    %402 = vector.load %arg8[%c8_121, %c0_122] : memref<16x4xf32, #tpu.memory_space<vmem>>, vector<2x4xf32>
    tpu.vector_store %arg8[%c8_121, %c0_122], %401 {strides = array<i32>} : memref<16x4xf32, #tpu.memory_space<vmem>>, vector<2x4xf32>,
    %403 = vector.extract_strided_slice %312 {offsets = [10, 0], sizes = [2, 4], strides = [1, 1]} : vector<16x32xf32> to vector<2x4xf32>
    %404 = vector.shape_cast %403 : vector<2x4xf32> to vector<1x2x4xf32>
    %cst_123 = arith.constant dense<0xFF800000> : vector<1xf32>
    %405 = vector.multi_reduction <maximumf>, %404, %cst_123 [1, 2] : vector<1x2x4xf32> to vector<1xf32>
    %406 = vector.shape_cast %405 : vector<1xf32> to vector<1x1x1xf32>
    %407 = vector.extract %406[0, 0, 0] : f32 from vector<1x1x1xf32>
    %408 = vector.broadcast %407 : f32 to vector<1x1xf32>
    %409 = vector.broadcast %408 : vector<1x1xf32> to vector<2x4xf32>
    %410 = arith.subf %403, %409 : vector<2x4xf32>
    %411 = math.exp %410 : vector<2x4xf32>
    %412 = vector.shape_cast %411 : vector<2x4xf32> to vector<1x2x4xf32>
    %cst_124 = arith.constant dense<0.000000e+00> : vector<1xf32>
    %413 = vector.multi_reduction <add>, %412, %cst_124 [1, 2] : vector<1x2x4xf32> to vector<1xf32>
    %414 = vector.shape_cast %413 : vector<1xf32> to vector<1x1x1xf32>
    %415 = vector.extract %414[0, 0, 0] : f32 from vector<1x1x1xf32>
    %416 = vector.broadcast %415 : f32 to vector<1x1xf32>
    %417 = tpu.reciprocal %416 : vector<1x1xf32> -> vector<1x1xf32>
    %418 = vector.broadcast %417 : vector<1x1xf32> to vector<2x4xf32>
    %419 = arith.mulf %411, %418 : vector<2x4xf32>
    %c10_125 = arith.constant 10 : index
    %c0_126 = arith.constant 0 : index
    %420 = vector.load %arg8[%c10_125, %c0_126] : memref<16x4xf32, #tpu.memory_space<vmem>>, vector<2x4xf32>
    tpu.vector_store %arg8[%c10_125, %c0_126], %419 {strides = array<i32>} : memref<16x4xf32, #tpu.memory_space<vmem>>, vector<2x4xf32>,
    %421 = vector.extract_strided_slice %312 {offsets = [12, 0], sizes = [2, 4], strides = [1, 1]} : vector<16x32xf32> to vector<2x4xf32>
    %422 = vector.shape_cast %421 : vector<2x4xf32> to vector<1x2x4xf32>
    %cst_127 = arith.constant dense<0xFF800000> : vector<1xf32>
    %423 = vector.multi_reduction <maximumf>, %422, %cst_127 [1, 2] : vector<1x2x4xf32> to vector<1xf32>
    %424 = vector.shape_cast %423 : vector<1xf32> to vector<1x1x1xf32>
    %425 = vector.extract %424[0, 0, 0] : f32 from vector<1x1x1xf32>
    %426 = vector.broadcast %425 : f32 to vector<1x1xf32>
    %427 = vector.broadcast %426 : vector<1x1xf32> to vector<2x4xf32>
    %428 = arith.subf %421, %427 : vector<2x4xf32>
    %429 = math.exp %428 : vector<2x4xf32>
    %430 = vector.shape_cast %429 : vector<2x4xf32> to vector<1x2x4xf32>
    %cst_128 = arith.constant dense<0.000000e+00> : vector<1xf32>
    %431 = vector.multi_reduction <add>, %430, %cst_128 [1, 2] : vector<1x2x4xf32> to vector<1xf32>
    %432 = vector.shape_cast %431 : vector<1xf32> to vector<1x1x1xf32>
    %433 = vector.extract %432[0, 0, 0] : f32 from vector<1x1x1xf32>
    %434 = vector.broadcast %433 : f32 to vector<1x1xf32>
    %435 = tpu.reciprocal %434 : vector<1x1xf32> -> vector<1x1xf32>
    %436 = vector.broadcast %435 : vector<1x1xf32> to vector<2x4xf32>
    %437 = arith.mulf %429, %436 : vector<2x4xf32>
    %c12_129 = arith.constant 12 : index
    %c0_130 = arith.constant 0 : index
    %438 = vector.load %arg8[%c12_129, %c0_130] : memref<16x4xf32, #tpu.memory_space<vmem>>, vector<2x4xf32>
    tpu.vector_store %arg8[%c12_129, %c0_130], %437 {strides = array<i32>} : memref<16x4xf32, #tpu.memory_space<vmem>>, vector<2x4xf32>,
    %439 = vector.extract_strided_slice %312 {offsets = [14, 0], sizes = [2, 4], strides = [1, 1]} : vector<16x32xf32> to vector<2x4xf32>
    %440 = vector.shape_cast %439 : vector<2x4xf32> to vector<1x2x4xf32>
    %cst_131 = arith.constant dense<0xFF800000> : vector<1xf32>
    %441 = vector.multi_reduction <maximumf>, %440, %cst_131 [1, 2] : vector<1x2x4xf32> to vector<1xf32>
    %442 = vector.shape_cast %441 : vector<1xf32> to vector<1x1x1xf32>
    %443 = vector.extract %442[0, 0, 0] : f32 from vector<1x1x1xf32>
    %444 = vector.broadcast %443 : f32 to vector<1x1xf32>
    %445 = vector.broadcast %444 : vector<1x1xf32> to vector<2x4xf32>
    %446 = arith.subf %439, %445 : vector<2x4xf32>
    %447 = math.exp %446 : vector<2x4xf32>
    %448 = vector.shape_cast %447 : vector<2x4xf32> to vector<1x2x4xf32>
    %cst_132 = arith.constant dense<0.000000e+00> : vector<1xf32>
    %449 = vector.multi_reduction <add>, %448, %cst_132 [1, 2] : vector<1x2x4xf32> to vector<1xf32>
    %450 = vector.shape_cast %449 : vector<1xf32> to vector<1x1x1xf32>
    %451 = vector.extract %450[0, 0, 0] : f32 from vector<1x1x1xf32>
    %452 = vector.broadcast %451 : f32 to vector<1x1xf32>
    %453 = tpu.reciprocal %452 : vector<1x1xf32> -> vector<1x1xf32>
    %454 = vector.broadcast %453 : vector<1x1xf32> to vector<2x4xf32>
    %455 = arith.mulf %447, %454 : vector<2x4xf32>
    %c14_133 = arith.constant 14 : index
    %c0_134 = arith.constant 0 : index
    %456 = vector.load %arg8[%c14_133, %c0_134] : memref<16x4xf32, #tpu.memory_space<vmem>>, vector<2x4xf32>
    tpu.vector_store %arg8[%c14_133, %c0_134], %455 {strides = array<i32>} : memref<16x4xf32, #tpu.memory_space<vmem>>, vector<2x4xf32>,
    return
  }
}

</mosaic_0001>

<bundles_post_ra>
// kernel: baseline_lstm_forward_seq.1
= control target key start
LH: loop header
LB: loop body
LE: loop exit
PB: predicated region body
PF: predicated region fallthrough
CT: control target
= control target key end

     0   :  { %16 = vsyncpa [#allocation4], 0  ;;  %s2475_s0 = inlined_call_operand.hbm [shape: f32[16,32], index: 0, kind: input, shape index: {}]   ;;  %s2476_s1 = inlined_call_operand.vmem [shape: f32[2,32], index: 1, kind: input, shape index: {}]   ;;  %s2477_s2 = inlined_call_operand.vmem [shape: f32[2,32], index: 2, kind: input, shape index: {}]   ;;  %s2478_s3 = inlined_call_operand.hbm [shape: bf16[6,32,32], index: 3, kind: input, shape index: {}]   ;;  %s2479_s4 = inlined_call_operand.vmem [shape: f32[6,1,32], index: 4, kind: input, shape index: {}]   ;;  %s2480_s5 = inlined_call_operand.vmem [shape: bf16[32,128], index: 5, kind: input, shape index: {}]   ;;  %s2481_s6 = inlined_call_operand.hbm [shape: bf16[32,128], index: 6, kind: input, shape index: {}]   ;;  %s2482_s7 = inlined_call_operand.vmem [shape: f32[1,128], index: 7, kind: input, shape index: {}]   ;;  %s2483_s8 = inlined_call_operand.vmem [shape: f32[16,4], index: 8, kind: output, shape index: {0}]   ;;  %s2484_s9 = inlined_call_operand.hbm [shape: f32[2,32], index: 9, kind: output, shape index: {1}]   ;;  %s2485_s10 = inlined_call_operand.hbm [shape: f32[2,32], index: 10, kind: output, shape index: {2}]  }
   0x1   :  { %17 = vsyncpa [#allocation7], 0 }
   0x2   :  { %18 = vsyncpa [#allocation5], 0 }
   0x3   :  { %19 = vsyncpa [#allocation11], 0  ;;  %s2039_s13 = smov [#allocation6]   ;;  %s1921_s17 = scalar_lea.hbm %s2478_s3, 1536 }
   0x4   :  { %s41_s14 = sshll.u32 %s2039_s13, 4  ;;  %p1922_p0 = scmp.ne.s32.totalorder %s2478_s3, %s1921_s17  ;;  %s42_s14 = int_to_ptr.vmem [resolvable:$true] %s41_s14 }
   0x5   :  { %p1925_p1 = scmp.lt.u32.totalorder %s1921_s17, %s2478_s3 }
   0x7   :  { %p1927_p2 = pnand %p1925_p1, %p1922_p0 }
   0x9   :  { %1930 = shalt.err (!%p1927_p2)
}
   0xa   :  { %s1931_s22 = scalar_lea.vmem %s42_s14, 1536  ;;  %p1936_p4 = scmp.lt.s32.totalorder %s42_s14, %s42_s14 }
   0xb   :  { %p1932_p3 = scmp.ne.s32.totalorder %s42_s14, %s1931_s22  ;;  %p1937_p5 = scmp.lt.s32.totalorder %s1931_s22, %s1931_s22 }
   0xd   :  { %p1938_p6 = por %p1937_p5, %p1936_p4 }
   0xf   :  { %p1939_p7 = pnand %p1938_p6, %p1932_p3 }
  0x11   :  { %1942 = shalt.err (!%p1939_p7)
}
  0x12   :  { %s2040_s23 = smov 64   ;;  %s2041_s24 = smov 4  }
  0x13   :  { %47 = dma.hbm_to_vmem [thread:$0]  %s2478_s3, 1536, %s42_s14, [#allocation7], %s2040_s23, %s2040_s23, %s2041_s24  }
  0x14   :  { %s2042_s27 = smov [#allocation3]   ;;  %s1943_s11 = scalar_lea.hbm %s2475_s0, 256 }
  0x15   :  { %s25_s28 = sshll.u32 %s2042_s27, 4  ;;  %p1944_p8 = scmp.ne.s32.totalorder %s2475_s0, %s1943_s11  ;;  %s26_s28 = int_to_ptr.vmem [resolvable:$true] %s25_s28 }
  0x16   :  { %p1947_p9 = scmp.lt.u32.totalorder %s1943_s11, %s2475_s0 }
  0x18   :  { %p1949_p10 = pnand %p1947_p9, %p1944_p8 }
  0x1a   :  { %1952 = shalt.err (!%p1949_p10)
}
  0x1b   :  { %s1953_s17 = scalar_lea.vmem %s26_s28, 256  ;;  %p1958_p12 = scmp.lt.s32.totalorder %s26_s28, %s26_s28 }
  0x1c   :  { %p1954_p11 = scmp.ne.s32.totalorder %s26_s28, %s1953_s17  ;;  %p1959_p13 = scmp.lt.s32.totalorder %s1953_s17, %s1953_s17 }
  0x1e   :  { %p1960_p0 = por %p1959_p13, %p1958_p12 }
  0x20   :  { %p1961_p1 = pnand %p1960_p0, %p1954_p11 }
  0x22   :  { %1964 = shalt.err (!%p1961_p1)
}
  0x23   :  { %s2043_s3 = smov 128   ;;  %s2044_s14 = smov 8  }
  0x24   :  { %31 = dma.hbm_to_vmem [thread:$0]  %s2475_s0, 256, %s26_s28, [#allocation4], %s2043_s3, %s2043_s3, %s2044_s14  }
  0x25   :  { %s2045_s20 = smov [#allocation8]   ;;  %s1965_s26 = scalar_lea.hbm %s2481_s6, 256 }
  0x26   :  { %s57_s21 = sshll.u32 %s2045_s20, 4  ;;  %p1966_p2 = scmp.ne.s32.totalorder %s2481_s6, %s1965_s26  ;;  %s58_s21 = int_to_ptr.vmem [resolvable:$true] %s57_s21 }
  0x27   :  { %p1969_p3 = scmp.lt.u32.totalorder %s1965_s26, %s2481_s6 }
  0x29   :  { %p1971_p4 = pnand %p1969_p3, %p1966_p2 }
  0x2b   :  { %1974 = shalt.err (!%p1971_p4)
}
  0x2c   :  { %s1975_s12 = scalar_lea.vmem %s58_s21, 256  ;;  %p1980_p6 = scmp.lt.s32.totalorder %s58_s21, %s58_s21 }
  0x2d   :  { %p1976_p5 = scmp.ne.s32.totalorder %s58_s21, %s1975_s12  ;;  %p1981_p7 = scmp.lt.s32.totalorder %s1975_s12, %s1975_s12 }
  0x2f   :  { %p1982_p8 = por %p1981_p7, %p1980_p6 }
  0x31   :  { %p1983_p9 = pnand %p1982_p8, %p1976_p5 }
  0x33   :  { %1986 = shalt.err (!%p1983_p9)
}
  0x34   :  { %63 = dma.hbm_to_vmem [thread:$0]  %s2481_s6, 256, %s58_s21, [#allocation7], %s2040_s23, %s2040_s23, %s2041_s24  }
  0x35   :  { %2031 = dma.done.wait [#allocation4], 256  }
  0x36   :  { %2032 = vsyncadd [#allocation4], 4294967040 }
  0x37   :  { %2033 = dma.done.wait [#allocation7], 1792  }
  0x38   :  { %2034 = vsyncadd [#allocation7], 4294965504  ;;  %v2046_v0 = vmov 0.0   ;;  %vm2047_vm0 = vmmov 0   ;;  %v1809_v1 = vld [vmem:[#allocation6] sm:$0xff]   ;;  %v1810_v2 = vld [vmem:[#allocation6 + $0x8] sm:$0xff]  }
  0x39   :  { %1644 = vmatprep.subr.bf16.mxu0 %v2046_v0  ;;  %1648 = vmatprep.mubr.msk.bf16.mxu0 %vm2047_vm0, %v2046_v0  ;;  %v76_v3 = vld [vmem:[#allocation3] sm:$0xff]  ;;  %v77_v4 = vld [vmem:[#allocation3 + $0x8] sm:$0xff]  ;;  %vm102_vm1 = vcmask 261120   ;;  %v1548_v8 = vld [vmem:[%s2479_s4] ss:$0 sm:$0xff]  ;;  %s2048_s29 = smov 32  }
  0x3a   :  { %1652 = vmatprep.subr.bf16.mxu1 %v2046_v0  ;;  %1656 = vmatprep.mubr.msk.bf16.mxu1 %vm2047_vm0, %v2046_v0  ;;  %v78_v5 = vpack.c.bf16 %v77_v4, %v76_v3  ;;  %v1811_v6 = vld [vmem:[#allocation6 + $0x10] sm:$0xff]   ;;  %v1812_v7 = vld [vmem:[#allocation6 + $0x18] sm:$0xff]   ;;  %v1813_v18 = vld [vmem:[#allocation6 + $0x20] sm:$0xff]   ;;  %vm528_vm2 = vcmask 254976   ;;  %vm697_vm3 = vcmask 259076   ;;  %vm612_vm4 = vcmask 257026  }
  0x3b   :  { %1645 = vmatpush3.bf16.msra.mxu0 %v1809_v1  ;;  %1653 = vmatpush3.bf16.msra.mxu1 %v1811_v6  ;;  %v1814_v19 = vld [vmem:[#allocation6 + $0x28] sm:$0xff]   ;;  %v1553_v20 = vld [vmem:[%s2479_s4 + $0x1] ss:$0 sm:$0xff]  ;;  %v1815_v30 = vld [vmem:[#allocation6 + $0x30] sm:$0xff]   ;;  %vm782_vm5 = vcmask 261126   ;;  %vm1268_vm6 = vcmask 25600  }
  0x3c   :  { %1646 = vmatprep.subr.bf16.mxu0 %v2046_v0  ;;  %1654 = vmatprep.subr.bf16.mxu1 %v2046_v0  ;;  %v1816_v31 = vld [vmem:[#allocation6 + $0x38] sm:$0xff]   ;;  %v1558_v32 = vld [vmem:[%s2479_s4 + $0x2] ss:$0 sm:$0xff]  ;;  %v2192_v44 = vld [vmem:[#allocation8 + $0x8] sm:$0xff]   ;;  %vm1297_vm7 = vcmask 27650   ;;  %vm1329_vm8 = vcmask 29700  }
  0x3d   :  { %v2184_v42 = vld [vmem:[#allocation8] sm:$0xff]   ;;  %v1819_v45 = vld [vmem:[%s2480_s5 + $0x8] sm:$0xff]   ;;  %vm1361_vm9 = vcmask 31750   ;;  %s2049_s11 = smov 96   ;;  %s2051_s28 = smov [#allocation10]  }
  0x3e   :  { %v1817_v43 = vld [vmem:[%s2480_s5] sm:$0xff]   ;;  %s1532_s6 = sshll.u32 %s2051_s28, 4  ;;  %s1533_s6 = int_to_ptr.vmem [resolvable:$true] %s1532_s6 }
  0x3f   :  { %1647 = vmatpush3.bf16.msra.mxu0 %v1810_v2  ;;  %1655 = vmatpush3.bf16.msra.mxu1 %v1812_v7  ;;  %v437_v46 = vld [vmem:[%s2476_s1] sm:$0x3]  ;;  %v1563_v48 = vld [vmem:[%s2479_s4 + $0x3] ss:$0 sm:$0xff] }
  0x40   :  { %1660 = vmatprep.subr.bf16.mxu0 %v2046_v0  ;;  %1668 = vmatprep.subr.bf16.mxu1 %v2046_v0  ;;  %v439_v47 = vpack.c.bf16 %v437_v46, %v437_v46  ;;  %v1567_v62 = vld [vmem:[%s2482_s7] ss:$0 sm:$0xff] }
  0x42   :  { %1649 = vmatmul.mubr.msk.bf16.vlgmr.msra.gmra.mrb[0].mxu0 %vm102_vm1, %v78_v5 }
  0x43   :  { %1664 = vmatprep.mubr.msk.bf16.mxu0 %vm2047_vm0, %v2046_v0  ;;  %1661 = vmatpush3.bf16.msra.mxu0 %v1813_v18 }
  0x44   :  { %1662 = vmatprep.subr.bf16.mxu0 %v2046_v0 }
  0x47   :  { %1663 = vmatpush3.bf16.msra.mxu0 %v1814_v19 }
  0x48   :  { %1676 = vmatprep.subr.bf16.mxu0 %v2046_v0 }
 0x115   :  { %v140_v9 = vpop.f32.mrb[0].mxu0 }
 0x116   :  { %v141_v10 = vadd.f32 %v1548_v8, %v140_v9  ;;  %v1650_v11 = vpop.f32.mrb[1].mxu0 }
 0x117   :  { %v143_v12 = vpop.f32.mrb[2].mxu0 }
 0x118   :  { %v144_v13 = vadd.f32 %v1548_v8, %v143_v12  ;;  %v1651_v14 = vpop.f32.mrb[3].mxu0  ;;  %v147_v15 = vmax.f32 %v141_v10, 0.0  ;;  %v438_v8 = vld [vmem:[%s2477_s2] sm:$0x3] }
 0x11a   :  { %v148_v16 = vmax.f32 %v144_v13, 0.0 }
 0x11c   :  { %v149_v17 = vpack.c.bf16 %v148_v16, %v147_v15 }
 0x11e   :  { %1657 = vmatmul.mubr.msk.bf16.vlgmr.msra.gmra.mrb[0].mxu1 %vm102_vm1, %v149_v17 }
 0x11f   :  { %1672 = vmatprep.mubr.msk.bf16.mxu1 %vm2047_vm0, %v2046_v0  ;;  %1669 = vmatpush3.bf16.msra.mxu1 %v1815_v30 }
 0x120   :  { %1670 = vmatprep.subr.bf16.mxu1 %v2046_v0 }
 0x123   :  { %1671 = vmatpush3.bf16.msra.mxu1 %v1816_v31 }
 0x124   :  { %1684 = vmatprep.subr.bf16.mxu1 %v2046_v0 }
 0x1f1   :  { %v212_v21 = vpop.f32.mrb[0].mxu1 }
 0x1f2   :  { %v213_v22 = vadd.f32 %v1553_v20, %v212_v21  ;;  %v1658_v23 = vpop.f32.mrb[1].mxu1 }
 0x1f3   :  { %v215_v24 = vpop.f32.mrb[2].mxu1 }
 0x1f4   :  { %v216_v25 = vadd.f32 %v1553_v20, %v215_v24  ;;  %v1659_v26 = vpop.f32.mrb[3].mxu1  ;;  %v219_v27 = vmax.f32 %v213_v22, 0.0 }
 0x1f6   :  { %v220_v28 = vmax.f32 %v216_v25, 0.0 }
 0x1f8   :  { %v221_v29 = vpack.c.bf16 %v220_v28, %v219_v27 }
 0x1fa   :  { %1665 = vmatmul.mubr.msk.bf16.vlgmr.msra.gmra.mrb[4].mxu0 %vm102_vm1, %v221_v29 }
 0x1fb   :  { %1680 = vmatprep.mubr.msk.bf16.mxu0 %vm2047_vm0, %v2046_v0  ;;  %1677 = vmatpush3.bf16.msra.mxu0 %v1817_v43 }
 0x1fc   :  { %1678 = vmatprep.subr.bf16.mxu0 %v2046_v0 }
 0x1ff   :  { %1679 = vmatpush3.bf16.msra.mxu0 %v1819_v45 }
 0x200   :  { %1692 = vmatprep.subr.bf16.mxu0 %v2046_v0 }
 0x2cd   :  { %v284_v33 = vpop.f32.mrb[4].mxu0 }
 0x2ce   :  { %v285_v34 = vadd.f32 %v1558_v32, %v284_v33  ;;  %v1666_v35 = vpop.f32.mrb[5].mxu0 }
 0x2cf   :  { %v287_v36 = vpop.f32.mrb[6].mxu0 }
 0x2d0   :  { %v288_v37 = vadd.f32 %v1558_v32, %v287_v36  ;;  %v1667_v38 = vpop.f32.mrb[7].mxu0  ;;  %v291_v39 = vmax.f32 %v285_v34, 0.0 }
 0x2d2   :  { %v292_v40 = vmax.f32 %v288_v37, 0.0 }
 0x2d4   :  { %v293_v41 = vpack.c.bf16 %v292_v40, %v291_v39 }
 0x2d6   :  { %1673 = vmatmul.mubr.msk.bf16.vlgmr.msra.gmra.mrb[4].mxu1 %vm102_vm1, %v293_v41 }
 0x2d7   :  { %1688 = vmatprep.mubr.msk.bf16.mxu1 %vm2047_vm0, %v2046_v0  ;;  %1685 = vmatpush3.bf16.msra.mxu1 %v2184_v42 }
 0x2d8   :  { %1686 = vmatprep.subr.bf16.mxu1 %v2046_v0 }
 0x2db   :  { %1687 = vmatpush3.bf16.msra.mxu1 %v2192_v44 }
 0x2dc   :  { %1700 = vmatprep.subr.bf16.mxu1 %v2046_v0 }
 0x2de   :  { %1689 = vmatmul.mubr.msk.bf16.vlgmr.msra.gmra.mrb[8].mxu1 %vm102_vm1, %v439_v47 }
 0x2df   :  { %1701 = vmatpush3.bf16.msra.mxu1 %v2184_v42  ;;  %1704 = vmatprep.mubr.msk.bf16.mxu1 %vm2047_vm0, %v2046_v0 }
 0x2e0   :  { %1702 = vmatprep.subr.bf16.mxu1 %v2046_v0 }
 0x2e3   :  { %1703 = vmatpush3.bf16.msra.mxu1 %v2192_v44 }
 0x2e4   :  { %1716 = vmatprep.subr.bf16.mxu1 %v2046_v0 }
 0x3a9   :  { %v356_v49 = vpop.f32.mrb[4].mxu1 }
 0x3aa   :  { %v357_v50 = vadd.f32 %v1563_v48, %v356_v49  ;;  %v1674_v51 = vpop.f32.mrb[5].mxu1 }
 0x3ab   :  { %v359_v52 = vpop.f32.mrb[6].mxu1 }
 0x3ac   :  { %v360_v53 = vadd.f32 %v1563_v48, %v359_v52  ;;  %v1675_v54 = vpop.f32.mrb[7].mxu1  ;;  %v363_v55 = vmax.f32 %v357_v50, 0.0 }
 0x3ae   :  { %v364_v56 = vmax.f32 %v360_v53, 0.0 }
 0x3b0   :  { %v365_v57 = vpack.c.bf16 %v364_v56, %v363_v55 }
 0x3b1   :  { %v489_v58 = vpop.f32.mrb[8].mxu1 }
 0x3b2   :  { %1681 = vmatmul.mubr.msk.bf16.vlgmr.msra.gmra.mrb[8].mxu0 %vm102_vm1, %v365_v57  ;;  %v1690_v59 = vpop.f32.mrb[9].mxu1 }
 0x3b3   :  { %1693 = vmatpush3.bf16.msra.mxu0 %v2184_v42  ;;  %1696 = vmatprep.mubr.msk.bf16.mxu0 %vm2047_vm0, %v2046_v0  ;;  %v492_v60 = vpop.f32.mrb[10].mxu1 }
 0x3b4   :  { %1694 = vmatprep.subr.bf16.mxu0 %v2046_v0  ;;  %v1691_v61 = vpop.f32.mrb[11].mxu1 }
 0x3b7   :  { %1695 = vmatpush3.bf16.msra.mxu0 %v2192_v44 }
 0x3b8   :  { %1708 = vmatprep.subr.bf16.mxu0 %v2046_v0 }
 0x485   :  { %v426_v63 = vpop.f32.mrb[8].mxu0 }
 0x486   :  { %v2223_v1 = vadd.f32 %v1567_v62, %v426_v63  ;;  %v1682_v2 = vpop.f32.mrb[9].mxu0 }
 0x487   :  { %v429_v3 = vpop.f32.mrb[10].mxu0 }
 0x488   :  { %v2225_v4 = vadd.f32 %v1567_v62, %v429_v3  ;;  %v1683_v5 = vpop.f32.mrb[11].mxu0  ;;  %v495_v6 = vadd.f32 %v489_v58, %v2223_v1 }
 0x48a   :  { %1825 = vtanh.f32 %v495_v6  ;;  %v1574_v9 = vmul.f32 -1.442695, %v495_v6 }
 0x48c   :  { %1827 = vpow2.f32 %v1574_v9 }
 0x494   :  { %v1826_v7 = vpop.eup %1825 }
 0x495   :  { %509 = vrot.lane.b32.xlu0 %v1826_v7, %s2040_s23 }
 0x496   :  { %v1828_v10 = vpop.eup %1827 }
 0x497   :  { %v499_v11 = vadd.f32 1.0, %v1828_v10 }
 0x499   :  { %504 = vrot.lane.b32.xlu0 %v438_v8, %s2048_s29  ;;  %1829 = vrcp.f32 %v499_v11 }
 0x4a3   :  { %v1830_v12 = vpop.eup %1829 }
 0x507   :  { %v510_v13 = vpop.permute.xlu0 %509 }
 0x508   :  { %v512_v14 = vmul.f32 %v1830_v12, %v510_v13 }
 0x50a   :  { %514 = vrot.lane.b32.xlu1 %v512_v14, %s2048_s29 }
 0x50b   :  { %v505_v15 = vpop.permute.xlu0 %504 }
 0x50c   :  { %v507_v16 = vmul.f32 %v1830_v12, %v505_v15 }
 0x57c   :  { %v515_v17 = vpop.permute.xlu1 %514 }
 0x57d   :  { %v517_v18 = vadd.f32 %v515_v17, %v507_v16 }
 0x57f   :  { %1831 = vtanh.f32 %v517_v18  ;;  %v589_v37 = vrot.slane %v517_v18, 6 }
 0x589   :  { %v1832_v19 = vpop.eup %1831 }
 0x58a   :  { %520 = vrot.lane.b32.xlu1 %v1832_v19, %s2040_s23 }
 0x5fc   :  { %v521_v20 = vpop.permute.xlu1 %520 }
 0x5fd   :  { %v2235_v21 = vmul.f32 %v1830_v12, %v521_v20 }
 0x5ff   :  { %v530_v22 = vpack.c.bf16 %v2235_v21, %v2235_v21 }
 0x601   :  { %532 = vrot.lane.b32.xlu0 %v530_v22, %s2048_s29 }
 0x673   :  { %v533_v23 = vpop.permute.xlu0 %532 }
 0x674   :  { %1697 = vmatmul.mubr.msk.bf16.vlgmr.msra.gmra.mrb[12].mxu0 %vm102_vm1, %v533_v23 }
 0x675   :  { %1709 = vmatpush3.bf16.msra.mxu0 %v2184_v42  ;;  %1712 = vmatprep.mubr.msk.bf16.mxu0 %vm2047_vm0, %v2046_v0 }
 0x676   :  { %1710 = vmatprep.subr.bf16.mxu0 %v2046_v0 }
 0x679   :  { %1711 = vmatpush3.bf16.msra.mxu0 %v2192_v44 }
 0x67a   :  { %1724 = vmatprep.subr.bf16.mxu0 %v2046_v0 }
 0x747   :  { %v571_v24 = vpop.f32.mrb[12].mxu0 }
 0x748   :  { %v578_v25 = vrot.slane %v571_v24, 6  ;;  %v1698_v26 = vpop.f32.mrb[13].mxu0 }
 0x749   :  { %v574_v27 = vpop.f32.mrb[14].mxu0 }
 0x74a   :  { %v580_v28 = vadd.f32 %v578_v25, %v2223_v1  ;;  %v1699_v29 = vpop.f32.mrb[15].mxu0 }
 0x74c   :  { %1833 = vtanh.f32 %v580_v28  ;;  %v1576_v31 = vmul.f32 -1.442695, %v580_v28 }
 0x74e   :  { %1835 = vpow2.f32 %v1576_v31 }
 0x756   :  { %v1834_v30 = vpop.eup %1833 }
 0x757   :  { %593 = vrot.lane.b32.xlu1 %v1834_v30, %s2040_s23 }
 0x758   :  { %v1836_v32 = vpop.eup %1835 }
 0x759   :  { %v584_v33 = vadd.f32 1.0, %v1836_v32 }
 0x75b   :  { %1837 = vrcp.f32 %v584_v33 }
 0x765   :  { %v1838_v34 = vpop.eup %1837 }
 0x766   :  { %v591_v38 = vmul.f32 %v1838_v34, %v589_v37 }
 0x7c9   :  { %v594_v35 = vpop.permute.xlu1 %593 }
 0x7ca   :  { %v596_v36 = vmul.f32 %v1838_v34, %v594_v35 }
 0x7cc   :  { %598 = vrot.lane.b32.xlu0 %v596_v36, %s2048_s29 }
 0x83e   :  { %v599_v39 = vpop.permute.xlu0 %598 }
 0x83f   :  { %v601_v40 = vadd.f32 %v599_v39, %v591_v38 }
 0x841   :  { %1839 = vtanh.f32 %v601_v40  ;;  %v674_v62 = vrot.slane %v601_v40, 6 }
 0x84b   :  { %v1840_v41 = vpop.eup %1839 }
 0x84c   :  { %604 = vrot.lane.b32.xlu1 %v1840_v41, %s2040_s23 }
 0x8be   :  { %v605_v43 = vpop.permute.xlu1 %604 }
 0x8bf   :  { %v2251_v45 = vmul.f32 %v1838_v34, %v605_v43 }
 0x8c1   :  { %v614_v46 = vpack.c.bf16 %v2251_v45, %v2251_v45 }
 0x8c3   :  { %v616_v47 = vrot.slane %v614_v46, 1 }
 0x8c5   :  { %617 = vrot.lane.b32.xlu0 %v616_v47, %s2048_s29 }
 0x937   :  { %v618_v48 = vpop.permute.xlu0 %617 }
 0x938   :  { %1705 = vmatmul.mubr.msk.bf16.vlgmr.msra.gmra.mrb[12].mxu1 %vm102_vm1, %v618_v48 }
 0x939   :  { %1717 = vmatpush3.bf16.msra.mxu1 %v2184_v42  ;;  %1720 = vmatprep.mubr.msk.bf16.mxu1 %vm2047_vm0, %v2046_v0 }
 0x93a   :  { %1718 = vmatprep.subr.bf16.mxu1 %v2046_v0 }
 0x93d   :  { %1719 = vmatpush3.bf16.msra.mxu1 %v2192_v44 }
 0x93e   :  { %1732 = vmatprep.subr.bf16.mxu1 %v2046_v0 }
 0xa0b   :  { %v656_v49 = vpop.f32.mrb[12].mxu1 }
 0xa0c   :  { %v663_v50 = vrot.slane %v656_v49, 4  ;;  %v1706_v51 = vpop.f32.mrb[13].mxu1 }
 0xa0d   :  { %v659_v52 = vpop.f32.mrb[14].mxu1 }
 0xa0e   :  { %v665_v53 = vadd.f32 %v663_v50, %v2223_v1  ;;  %v1707_v54 = vpop.f32.mrb[15].mxu1 }
 0xa10   :  { %1841 = vtanh.f32 %v665_v53  ;;  %v1578_v56 = vmul.f32 -1.442695, %v665_v53 }
 0xa12   :  { %1843 = vpow2.f32 %v1578_v56 }
 0xa1a   :  { %v1842_v55 = vpop.eup %1841 }
 0xa1b   :  { %678 = vrot.lane.b32.xlu1 %v1842_v55, %s2040_s23 }
 0xa1c   :  { %v1844_v57 = vpop.eup %1843 }
 0xa1d   :  { %v669_v58 = vadd.f32 1.0, %v1844_v57 }
 0xa1f   :  { %1845 = vrcp.f32 %v669_v58 }
 0xa29   :  { %v1846_v59 = vpop.eup %1845 }
 0xa2a   :  { %v676_v63 = vmul.f32 %v1846_v59, %v674_v62 }
 0xa8d   :  { %v679_v60 = vpop.permute.xlu1 %678 }
 0xa8e   :  { %v681_v61 = vmul.f32 %v1846_v59, %v679_v60 }
 0xa90   :  { %683 = vrot.lane.b32.xlu0 %v681_v61, %s2048_s29 }
 0xb02   :  { %v684_v2 = vpop.permute.xlu0 %683 }
 0xb03   :  { %v686_v3 = vadd.f32 %v684_v2, %v676_v63 }
 0xb05   :  { %1847 = vtanh.f32 %v686_v3  ;;  %v759_v25 = vrot.slane %v686_v3, 6 }
 0xb0f   :  { %v1848_v5 = vpop.eup %1847 }
 0xb10   :  { %689 = vrot.lane.b32.xlu1 %v1848_v5, %s2040_s23 }
 0xb82   :  { %v690_v6 = vpop.permute.xlu1 %689 }
 0xb83   :  { %v2267_v7 = vmul.f32 %v1846_v59, %v690_v6 }
 0xb85   :  { %v699_v8 = vpack.c.bf16 %v2267_v7, %v2267_v7 }
 0xb87   :  { %v701_v9 = vrot.slane %v699_v8, 2 }
 0xb89   :  { %702 = vrot.lane.b32.xlu0 %v701_v9, %s2048_s29 }
 0xbfb   :  { %v703_v10 = vpop.permute.xlu0 %702 }
 0xbfc   :  { %1713 = vmatmul.mubr.msk.bf16.vlgmr.msra.gmra.mrb[16].mxu0 %vm102_vm1, %v703_v10 }
 0xbfd   :  { %1725 = vmatpush3.bf16.msra.mxu0 %v2184_v42  ;;  %1728 = vmatprep.mubr.msk.bf16.mxu0 %vm2047_vm0, %v2046_v0 }
 0xbfe   :  { %1726 = vmatprep.subr.bf16.mxu0 %v2046_v0 }
 0xc01   :  { %1727 = vmatpush3.bf16.msra.mxu0 %v2192_v44 }
 0xc02   :  { %1740 = vmatprep.subr.bf16.mxu0 %v2046_v0 }
 0xccf   :  { %v741_v11 = vpop.f32.mrb[16].mxu0 }
 0xcd0   :  { %v748_v12 = vrot.slane %v741_v11, 2  ;;  %v1714_v13 = vpop.f32.mrb[17].mxu0 }
 0xcd1   :  { %v744_v14 = vpop.f32.mrb[18].mxu0 }
 0xcd2   :  { %v750_v15 = vadd.f32 %v748_v12, %v2223_v1  ;;  %v1715_v16 = vpop.f32.mrb[19].mxu0 }
 0xcd4   :  { %1849 = vtanh.f32 %v750_v15  ;;  %v1580_v18 = vmul.f32 -1.442695, %v750_v15 }
 0xcd6   :  { %1851 = vpow2.f32 %v1580_v18 }
 0xcde   :  { %v1850_v17 = vpop.eup %1849 }
 0xcdf   :  { %763 = vrot.lane.b32.xlu1 %v1850_v17, %s2040_s23 }
 0xce0   :  { %v1852_v19 = vpop.eup %1851 }
 0xce1   :  { %v754_v20 = vadd.f32 1.0, %v1852_v19 }
 0xce3   :  { %1853 = vrcp.f32 %v754_v20 }
 0xced   :  { %v1854_v22 = vpop.eup %1853 }
 0xcee   :  { %v761_v26 = vmul.f32 %v1854_v22, %v759_v25 }
 0xd51   :  { %v764_v23 = vpop.permute.xlu1 %763 }
 0xd52   :  { %v766_v24 = vmul.f32 %v1854_v22, %v764_v23 }
 0xd54   :  { %768 = vrot.lane.b32.xlu0 %v766_v24, %s2048_s29 }
 0xdc6   :  { %v769_v27 = vpop.permute.xlu0 %768 }
 0xdc7   :  { %v771_v28 = vadd.f32 %v769_v27, %v761_v26 }
 0xdc9   :  { %1855 = vtanh.f32 %v771_v28  ;;  %v841_v49 = vrot.slane %v771_v28, 6 }
 0xdd3   :  { %v1856_v1 = vpop.eup %1855 }
 0xdd4   :  { %774 = vrot.lane.b32.xlu1 %v1856_v1, %s2040_s23 }
 0xe46   :  { %v775_v29 = vpop.permute.xlu1 %774 }
 0xe47   :  { %v2283_v30 = vmul.f32 %v1854_v22, %v775_v29 }
 0xe49   :  { %v784_v31 = vpack.c.bf16 %v2283_v30, %v2283_v30 }
 0xe4b   :  { %v786_v32 = vrot.slane %v784_v31, 3 }
 0xe4d   :  { %787 = vrot.lane.b32.xlu0 %v786_v32, %s2048_s29 }
 0xebf   :  { %v788_v33 = vpop.permute.xlu0 %787 }
 0xec0   :  { %1721 = vmatmul.mubr.msk.bf16.vlgmr.msra.gmra.mrb[16].mxu1 %vm102_vm1, %v788_v33 }
 0xec1   :  { %1733 = vmatpush3.bf16.msra.mxu1 %v2184_v42  ;;  %1736 = vmatprep.mubr.msk.bf16.mxu1 %vm2047_vm0, %v2046_v0 }
 0xec2   :  { %1734 = vmatprep.subr.bf16.mxu1 %v2046_v0 }
 0xec5   :  { %1735 = vmatpush3.bf16.msra.mxu1 %v2192_v44 }
 0xec6   :  { %1748 = vmatprep.subr.bf16.mxu1 %v2046_v0 }
 0xf93   :  { %v826_v34 = vpop.f32.mrb[16].mxu1 }
 0xf94   :  { %v832_v35 = vadd.f32 %v826_v34, %v2225_v4  ;;  %v1722_v36 = vpop.f32.mrb[17].mxu1 }
 0xf95   :  { %v829_v37 = vpop.f32.mrb[18].mxu1 }
 0xf96   :  { %1857 = vtanh.f32 %v832_v35  ;;  %v1723_v38 = vpop.f32.mrb[19].mxu1  ;;  %v1582_v40 = vmul.f32 -1.442695, %v832_v35 }
 0xf98   :  { %1859 = vpow2.f32 %v1582_v40 }
 0xfa0   :  { %v1858_v39 = vpop.eup %1857 }
 0xfa1   :  { %845 = vrot.lane.b32.xlu1 %v1858_v39, %s2040_s23 }
 0xfa2   :  { %v1860_v41 = vpop.eup %1859 }
 0xfa3   :  { %v836_v43 = vadd.f32 1.0, %v1860_v41 }
 0xfa5   :  { %1861 = vrcp.f32 %v836_v43 }
 0xfaf   :  { %v1862_v46 = vpop.eup %1861 }
 0xfb0   :  { %v843_v50 = vmul.f32 %v1862_v46, %v841_v49 }
0x1013   :  { %v846_v47 = vpop.permute.xlu1 %845 }
0x1014   :  { %v848_v48 = vmul.f32 %v1862_v46, %v846_v47 }
0x1016   :  { %850 = vrot.lane.b32.xlu0 %v848_v48, %s2048_s29 }
0x1088   :  { %v851_v51 = vpop.permute.xlu0 %850 }
0x1089   :  { %v853_v52 = vadd.f32 %v851_v51, %v843_v50 }
0x108b   :  { %1863 = vtanh.f32 %v853_v52  ;;  %v924_v9 = vrot.slane %v853_v52, 6 }
0x1095   :  { %v1864_v53 = vpop.eup %1863 }
0x1096   :  { %856 = vrot.lane.b32.xlu1 %v1864_v53, %s2040_s23 }
0x1108   :  { %v857_v54 = vpop.permute.xlu1 %856 }
0x1109   :  { %v2299_v55 = vmul.f32 %v1862_v46, %v857_v54 }
0x110b   :  { %v865_v56 = vpack.c.bf16 %v2299_v55, %v2299_v55 }
0x110d   :  { %867 = vrot.lane.b32.xlu0 %v865_v56, %s2048_s29 }
0x117f   :  { %v868_v57 = vpop.permute.xlu0 %867 }
0x1180   :  { %1729 = vmatmul.mubr.msk.bf16.vlgmr.msra.gmra.mrb[20].mxu0 %vm102_vm1, %v868_v57 }
0x1181   :  { %1741 = vmatpush3.bf16.msra.mxu0 %v2184_v42  ;;  %1744 = vmatprep.mubr.msk.bf16.mxu0 %vm2047_vm0, %v2046_v0 }
0x1182   :  { %1742 = vmatprep.subr.bf16.mxu0 %v2046_v0 }
0x1185   :  { %1743 = vmatpush3.bf16.msra.mxu0 %v2192_v44 }
0x1186   :  { %1756 = vmatprep.subr.bf16.mxu0 %v2046_v0 }
0x1253   :  { %v906_v58 = vpop.f32.mrb[20].mxu0 }
0x1254   :  { %v913_v59 = vrot.slane %v906_v58, 6  ;;  %v1730_v60 = vpop.f32.mrb[21].mxu0 }
0x1255   :  { %v909_v61 = vpop.f32.mrb[22].mxu0 }
0x1256   :  { %v915_v62 = vadd.f32 %v913_v59, %v2225_v4  ;;  %v1731_v63 = vpop.f32.mrb[23].mxu0 }
0x1258   :  { %1865 = vtanh.f32 %v915_v62  ;;  %v1584_v42 = vmul.f32 -1.442695, %v915_v62 }
0x125a   :  { %1867 = vpow2.f32 %v1584_v42  ;;  %v1821_v42 = vld [vmem:[#allocation6 + $0x40] sm:$0xff]  }
0x1262   :  { %v1866_v2 = vpop.eup %1865 }
0x1263   :  { %928 = vrot.lane.b32.xlu1 %v1866_v2, %s2040_s23 }
0x1264   :  { %v1868_v3 = vpop.eup %1867 }
0x1265   :  { %v919_v5 = vadd.f32 1.0, %v1868_v3  ;;  %v1822_v3 = vld [vmem:[#allocation6 + $0x48] sm:$0xff]  }
0x1267   :  { %1869 = vrcp.f32 %v919_v5 }
0x1271   :  { %v1870_v6 = vpop.eup %1869 }
0x1272   :  { %v926_v10 = vmul.f32 %v1870_v6, %v924_v9 }
0x12d5   :  { %v929_v44 = vpop.permute.xlu1 %928 }
0x12d6   :  { %v931_v8 = vmul.f32 %v1870_v6, %v929_v44 }
0x12d8   :  { %933 = vrot.lane.b32.xlu0 %v931_v8, %s2048_s29 }
0x134a   :  { %v934_v11 = vpop.permute.xlu0 %933 }
0x134b   :  { %v936_v12 = vadd.f32 %v934_v11, %v926_v10 }
0x134d   :  { %1871 = vtanh.f32 %v936_v12  ;;  %v1008_v33 = vrot.slane %v936_v12, 6 }
0x1357   :  { %v1872_v13 = vpop.eup %1871 }
0x1358   :  { %939 = vrot.lane.b32.xlu1 %v1872_v13, %s2040_s23 }
0x13ca   :  { %v940_v14 = vpop.permute.xlu1 %939 }
0x13cb   :  { %v2315_v15 = vmul.f32 %v1870_v6, %v940_v14  ;;  %v1823_v14 = vld [vmem:[#allocation6 + $0x50] sm:$0xff]  }
0x13cd   :  { %v948_v16 = vpack.c.bf16 %v2315_v15, %v2315_v15 }
0x13cf   :  { %v950_v17 = vrot.slane %v948_v16, 1  ;;  %v1590_v16 = vld [vmem:[%s2479_s4 + $0x4] ss:$0 sm:$0xff] }
0x13d1   :  { %951 = vrot.lane.b32.xlu0 %v950_v17, %s2048_s29 }
0x1443   :  { %v952_v18 = vpop.permute.xlu0 %951 }
0x1444   :  { %1737 = vmatmul.mubr.msk.bf16.vlgmr.msra.gmra.mrb[20].mxu1 %vm102_vm1, %v952_v18 }
0x1445   :  { %1752 = vmatprep.mubr.msk.bf16.mxu1 %vm2047_vm0, %v2046_v0  ;;  %1749 = vmatpush3.bf16.msra.mxu1 %v1821_v42 }
0x1446   :  { %1750 = vmatprep.subr.bf16.mxu1 %v2046_v0 }
0x1449   :  { %1751 = vmatpush3.bf16.msra.mxu1 %v1822_v3 }
0x1517   :  { %v990_v19 = vpop.f32.mrb[20].mxu1 }
0x1518   :  { %v997_v20 = vrot.slane %v990_v19, 4  ;;  %v1738_v22 = vpop.f32.mrb[21].mxu1 }
0x1519   :  { %v993_v23 = vpop.f32.mrb[22].mxu1 }
0x151a   :  { %v999_v24 = vadd.f32 %v997_v20, %v2225_v4  ;;  %v1739_v25 = vpop.f32.mrb[23].mxu1 }
0x151c   :  { %1873 = vtanh.f32 %v999_v24  ;;  %v1586_v27 = vmul.f32 -1.442695, %v999_v24 }
0x151e   :  { %1875 = vpow2.f32 %v1586_v27 }
0x1526   :  { %v1874_v26 = vpop.eup %1873 }
0x1527   :  { %1012 = vrot.lane.b32.xlu1 %v1874_v26, %s2040_s23 }
0x1528   :  { %v1876_v28 = vpop.eup %1875 }
0x1529   :  { %v1003_v1 = vadd.f32 1.0, %v1876_v28 }
0x152b   :  { %1877 = vrcp.f32 %v1003_v1 }
0x1535   :  { %v1878_v29 = vpop.eup %1877 }
0x1536   :  { %v1010_v34 = vmul.f32 %v1878_v29, %v1008_v33 }
0x1599   :  { %v1013_v31 = vpop.permute.xlu1 %1012 }
0x159a   :  { %v1015_v32 = vmul.f32 %v1878_v29, %v1013_v31 }
0x159c   :  { %1017 = vrot.lane.b32.xlu0 %v1015_v32, %s2048_s29 }
0x160e   :  { %v1018_v35 = vpop.permute.xlu0 %1017 }
0x160f   :  { %v1020_v36 = vadd.f32 %v1018_v35, %v1010_v34 }
0x1611   :  { %1879 = vtanh.f32 %v1020_v36 }
0x161b   :  { %v1880_v37 = vpop.eup %1879 }
0x161c   :  { %1023 = vrot.lane.b32.xlu1 %v1880_v37, %s2040_s23 }
0x168e   :  { %v1024_v38 = vpop.permute.xlu1 %1023 }
0x168f   :  { %v1026_v39 = vmul.f32 %v1878_v29, %v1024_v38 }
0x1691   :  { %v1032_v40 = vpack.c.bf16 %v1026_v39, %v1026_v39 }
0x1693   :  { %v1034_v41 = vrot.slane %v1032_v40, 2 }
0x1695   :  { %1035 = vrot.lane.b32.xlu0 %v1034_v41, %s2048_s29 }
0x1707   :  { %v1036_v43 = vpop.permute.xlu0 %1035 }
0x1708   :  { %1745 = vmatmul.mubr.msk.bf16.vlgmr.msra.gmra.mrb[24].mxu0 %vm102_vm1, %v1036_v43 }
0x1709   :  { %1760 = vmatprep.mubr.msk.bf16.mxu0 %vm2047_vm0, %v2046_v0  ;;  %1757 = vmatpush3.bf16.msra.mxu0 %v1823_v14 }
0x170a   :  { %1758 = vmatprep.subr.bf16.mxu0 %v2046_v0  ;;  %v1595_v0 = vld [vmem:[%s2479_s4 + $0x5] ss:$0 sm:$0xff] }
0x17db   :  { %v1074_v46 = vpop.f32.mrb[24].mxu0 }
0x17dc   :  { %v1081_v47 = vrot.slane %v1074_v46, 2  ;;  %v1746_v48 = vpop.f32.mrb[25].mxu0 }
0x17dd   :  { %v1077_v49 = vpop.f32.mrb[26].mxu0 }
0x17de   :  { %v1083_v50 = vadd.f32 %v1081_v47, %v2225_v4  ;;  %v1747_v51 = vpop.f32.mrb[27].mxu0  ;;  %v1092_v4 = vrot.slane %v1020_v36, 6 }
0x17e0   :  { %1881 = vtanh.f32 %v1083_v50  ;;  %v1588_v53 = vmul.f32 -1.442695, %v1083_v50 }
0x17e2   :  { %1883 = vpow2.f32 %v1588_v53 }
0x17ea   :  { %v1882_v52 = vpop.eup %1881 }
0x17eb   :  { %1096 = vrot.lane.b32.xlu1 %v1882_v52, %s2040_s23 }
0x17ec   :  { %v1884_v54 = vpop.eup %1883 }
0x17ed   :  { %v1087_v56 = vadd.f32 1.0, %v1884_v54 }
0x17ef   :  { %1885 = vrcp.f32 %v1087_v56 }
0x17f9   :  { %v1886_v57 = vpop.eup %1885 }
0x17fa   :  { %v1094_v60 = vmul.f32 %v1886_v57, %v1092_v4 }
0x185d   :  { %v1097_v58 = vpop.permute.xlu1 %1096 }
0x185e   :  { %v1099_v59 = vmul.f32 %v1886_v57, %v1097_v58 }
0x1860   :  { %1101 = vrot.lane.b32.xlu0 %v1099_v59, %s2048_s29 }
0x1864   :  { %525 = vrot.lane.b32.xlu0 %v2235_v21, %s2048_s29 }
0x1868   :  { %694 = vrot.lane.b32.xlu0 %v2267_v7, %s2048_s29 }
0x186c   :  { %861 = vrot.lane.b32.xlu0 %v2299_v55, %s2048_s29 }
0x1870   :  { %1028 = vrot.lane.b32.xlu0 %v1026_v39, %s2048_s29 }
0x18d2   :  { %v1102_v61 = vpop.permute.xlu0 %1101 }
0x18d3   :  { %v2341_v62 = vadd.f32 %v1102_v61, %v1094_v60 }
0x18d5   :  { %1887 = vtanh.f32 %v2341_v62 }
0x18d6   :  { %v526_v63 = vpop.permute.xlu0 %525 }
0x18d7   :  { %529 = vst.msk [vmem:[#allocation2] sm:$0x3] %vm528_vm2, %v526_v63 }
0x18da   :  { %v695_v21 = vpop.permute.xlu0 %694 }
0x18db   :  { %698 = vst.msk [vmem:[#allocation2] sm:$0x30] %vm697_vm3, %v695_v21 }
0x18de   :  { %v862_v2 = vpop.permute.xlu0 %861 }
0x18df   :  { %v1888_v7 = vpop.eup %1887  ;;  %864 = vst.msk [vmem:[#allocation2 + $0x8] sm:$0x3] %vm528_vm2, %v862_v2 }
0x18e0   :  { %1107 = vrot.lane.b32.xlu1 %v1888_v7, %s2040_s23 }
0x18e2   :  { %v1029_v55 = vpop.permute.xlu0 %1028 }
0x18e3   :  { %1031 = vst.msk [vmem:[#allocation2 + $0x8] sm:$0x30] %vm697_vm3, %v1029_v55 }
0x18e4   :  { %609 = vrot.lane.b32.xlu1 %v2251_v45, %s2048_s29 }
0x18e8   :  { %779 = vrot.lane.b32.xlu1 %v2283_v30, %s2048_s29 }
0x18ec   :  { %944 = vrot.lane.b32.xlu1 %v2315_v15, %s2048_s29  ;;  %v1824_v15 = vld [vmem:[#allocation6 + $0x58] sm:$0xff]  }
0x18ed   :  { %1759 = vmatpush3.bf16.msra.mxu0 %v1824_v15 }
0x1952   :  { %v1108_v5 = vpop.permute.xlu1 %1107 }
0x1953   :  { %v1110_v6 = vmul.f32 %v1886_v57, %v1108_v5 }
0x1955   :  { %1112 = vrot.lane.b32.xlu1 %v1110_v6, %s2048_s29 }
0x1956   :  { %v610_v44 = vpop.permute.xlu1 %609 }
0x1957   :  { %613 = vst.msk [vmem:[#allocation2] sm:$0xc] %vm612_vm4, %v610_v44 }
0x195a   :  { %v780_v45 = vpop.permute.xlu1 %779 }
0x195b   :  { %783 = vst.msk [vmem:[#allocation2] sm:$0xc0] %vm782_vm5, %v780_v45 }
0x195e   :  { %v945_v30 = vpop.permute.xlu1 %944 }
0x195f   :  { %947 = vst.msk [vmem:[#allocation2 + $0x8] sm:$0xc] %vm612_vm4, %v945_v30 }
0x1962   :  { %v1122_v9 = vld [vmem:[#allocation2] sm:$0xff] }
0x1963   :  { %v1124_v11 = vmax.f32 %v1122_v9, 0.0 }
0x19c7   :  { %v1113_v8 = vpop.permute.xlu1 %1112 }
0x19c8   :  { %1115 = vst.msk [vmem:[#allocation2 + $0x8] sm:$0xc0] %vm782_vm5, %v1113_v8  ;;  %1116 = vst.msk [vmem:[#allocation9 - $0x6] sm:$0xc0] %vm782_vm5, %v1113_v8 }
0x19cf   :  { %v1123_v10 = vld [vmem:[#allocation2 + $0x8] sm:$0xff] }
0x19d0   :  { %v1125_v12 = vmax.f32 %v1123_v10, 0.0 }
0x19d2   :  { %v1126_v13 = vpack.c.bf16 %v1125_v12, %v1124_v11 }
0x19d4   :  { %1753 = vmatmul.mubr.msk.bf16.vlgmr.msra.gmra.mrb[24].mxu1 %vm102_vm1, %v1126_v13 }
0x1aa7   :  { %v1189_v17 = vpop.f32.mrb[24].mxu1 }
0x1aa8   :  { %v1190_v18 = vadd.f32 %v1590_v16, %v1189_v17  ;;  %v1754_v19 = vpop.f32.mrb[25].mxu1 }
0x1aa9   :  { %v1192_v20 = vpop.f32.mrb[26].mxu1 }
0x1aaa   :  { %v1193_v22 = vadd.f32 %v1590_v16, %v1192_v20  ;;  %v1755_v23 = vpop.f32.mrb[27].mxu1  ;;  %v1196_v24 = vmax.f32 %v1190_v18, 0.0 }
0x1aac   :  { %v1197_v25 = vmax.f32 %v1193_v22, 0.0 }
0x1aae   :  { %v1198_v26 = vpack.c.bf16 %v1197_v25, %v1196_v24 }
0x1ab0   :  { %1761 = vmatmul.mubr.msk.bf16.vlgmr.msra.gmra.mrb[28].mxu0 %vm102_vm1, %v1198_v26 }
0x1b83   :  { %v1261_v27 = vpop.f32.mrb[28].mxu0 }
0x1b84   :  { %v2365_v28 = vadd.f32 %v1595_v0, %v1261_v27  ;;  %v1762_v1 = vpop.f32.mrb[29].mxu0 }
0x1b85   :  { %v1264_v29 = vpop.f32.mrb[30].mxu0 }
0x1b86   :  { %v2367_v31 = vadd.f32 %v1595_v0, %v1264_v29  ;;  %v1763_v32 = vpop.f32.mrb[31].mxu0  ;;  %v1269_v33 = vsel %vm1268_vm6, %v2365_v28, -inf  ;;  %v1298_v34 = vsel %vm1297_vm7, %v2365_v28, -inf  ;;  %v1330_v50 = vsel %vm1329_vm8, %v2365_v28, -inf }
0x1b87   :  { %1270 = vmax.xlane.f32.xlu0 %v1269_v33  ;;  %v1362_v51 = vsel %vm1361_vm9, %v2365_v28, -inf }
0x1b88   :  { %v1393_v52 = vsel %vm1268_vm6, %v2367_v31, -inf  ;;  %v1421_v53 = vsel %vm1297_vm7, %v2367_v31, -inf  ;;  %v1452_v54 = vsel %vm1329_vm8, %v2367_v31, -inf  ;;  %v1483_v56 = vsel %vm1361_vm9, %v2367_v31, -inf }
0x1b8b   :  { %1299 = vmax.xlane.f32.xlu0 %v1298_v34 }
0x1c14   :  { %v1271_v35 = vpop.xlane.xlu0 %1270 }
0x1c15   :  { %v1272_v36 = vrot.slane %v1271_v35, 4 }
0x1c17   :  { %v1273_v37 = vmax.f32 %v1271_v35, %v1272_v36 }
0x1c18   :  { %v1300_v57 = vpop.xlane.xlu0 %1299 }
0x1c19   :  { %v1274_v38 = vrot.slane %v1273_v37, 2  ;;  %v1301_v58 = vrot.slane %v1300_v57, 4 }
0x1c1b   :  { %v1275_v39 = vmax.f32 %v1273_v37, %v1274_v38  ;;  %v1302_v59 = vmax.f32 %v1300_v57, %v1301_v58 }
0x1c1d   :  { %v1276_v40 = vrot.slane %v1275_v39, 1  ;;  %v1303_v4 = vrot.slane %v1302_v59, 2 }
0x1c1f   :  { %v1277_v41 = vmax.f32 %v1275_v39, %v1276_v40  ;;  %v1304_v2 = vmax.f32 %v1302_v59, %v1303_v4 }
0x1c21   :  { %1764 = vpush %v1277_v41  ;;  %v1305_v3 = vrot.slane %v1304_v2, 1 }
0x1c23   :  { %v1306_v45 = vmax.f32 %v1304_v2, %v1305_v3 }
0x1c52   :  { %s1765_s4 = spop %1764 }
0x1c53   :  { %v1279_v43 = vstv %s1765_s4 }
0x1c54   :  { %v1280_v46 = vsub.f32 %v2365_v28, %v1279_v43 }
0x1c56   :  { %v1281_v47 = vmul.f32 1.442695, %v1280_v46 }
0x1c58   :  { %1889 = vpow2.f32 %v1281_v47 }
0x1c62   :  { %v1890_v48 = vpop.eup %1889 }
0x1c63   :  { %v1283_v49 = vsel %vm1268_vm6, %v1890_v48, 0.0 }
0x1c64   :  { %1284 = vadd.xlane.f32.xlu1 %v1283_v49 }
0x1c68   :  { %1331 = vmax.xlane.f32.xlu1 %v1330_v50 }
0x1c6c   :  { %1363 = vmax.xlane.f32.xlu1 %v1362_v51 }
0x1c70   :  { %1394 = vmax.xlane.f32.xlu1 %v1393_v52 }
0x1c74   :  { %1422 = vmax.xlane.f32.xlu1 %v1421_v53 }
0x1c78   :  { %1453 = vmax.xlane.f32.xlu1 %v1452_v54 }
0x1c7c   :  { %1484 = vmax.xlane.f32.xlu1 %v1483_v56 }
0x1c8d   :  { %1118 = vrot.lane.b32.xlu1 %v2341_v62, %s2049_s11 }
0x1cf1   :  { %v1285_v60 = vpop.xlane.xlu1 %1284 }
0x1cf2   :  { %v1286_v61 = vrot.slane %v1285_v60, 4 }
0x1cf4   :  { %v1287_v63 = vadd.f32 %v1286_v61, %v1285_v60 }
0x1cf5   :  { %v1332_v21 = vpop.xlane.xlu1 %1331 }
0x1cf6   :  { %v1288_v7 = vrot.slane %v1287_v63, 2  ;;  %v1333_v19 = vrot.slane %v1332_v21, 4 }
0x1cf8   :  { %v1289_v55 = vadd.f32 %v1288_v7, %v1287_v63  ;;  %v1334_v20 = vmax.f32 %v1332_v21, %v1333_v19 }
0x1cf9   :  { %v1364_v42 = vpop.xlane.xlu1 %1363 }
0x1cfa   :  { %v1290_v5 = vrot.slane %v1289_v55, 1  ;;  %v1335_v22 = vrot.slane %v1334_v20, 2  ;;  %v1365_v46 = vrot.slane %v1364_v42, 4 }
0x1cfc   :  { %v1291_v6 = vadd.f32 %v1290_v5, %v1289_v55  ;;  %v1336_v26 = vmax.f32 %v1334_v20, %v1335_v22  ;;  %v1366_v47 = vmax.f32 %v1364_v42, %v1365_v46 }
0x1cfd   :  { %v2388_v44 = vpop.xlane.xlu1 %1394 }
0x1cfe   :  { %1766 = vpush %v1291_v6  ;;  %v1337_v1 = vrot.slane %v1336_v26, 1  ;;  %v1396_v3 = vrot.slane %v2388_v44, 4 }
0x1cff   :  { %1768 = vpush %v1306_v45 }
0x1d00   :  { %v1338_v33 = vmax.f32 %v1336_v26, %v1337_v1  ;;  %v1397_v5 = vmax.f32 %v2388_v44, %v1396_v3 }
0x1d01   :  { %v2390_v62 = vpop.xlane.xlu1 %1422 }
0x1d02   :  { %v1398_v6 = vrot.slane %v1397_v5, 2 }
0x1d05   :  { %v2392_v30 = vpop.xlane.xlu1 %1453 }
0x1d09   :  { %v2394_v8 = vpop.xlane.xlu1 %1484 }
0x1d0d   :  { %v1119_v9 = vpop.permute.xlu1 %1118 }
0x1d0e   :  { %1121 = vst.msk [vmem:[#allocation10 - $0x6] sm:$0xc0] %vm782_vm5, %v1119_v9 }
0x1d2f   :  { %s1767_s12 = spop %1766 }
0x1d30   :  { %v1293_v10 = vstv %s1767_s12  ;;  %s1769_s0 = spop %1768  ;;  %s2050_s12 = smov [#allocation9]  }
0x1d31   :  { %1891 = vrcp.f32 %v1293_v10  ;;  %v1308_v11 = vstv %s1769_s0  ;;  %v1399_v10 = vmax.f32 %v1397_v5, %v1398_v6  ;;  %s1522_s0 = sshll.u32 %s2050_s12, 4  ;;  %s1523_s0 = int_to_ptr.vmem [resolvable:$true] %s1522_s0 }
0x1d32   :  { %v1309_v12 = vsub.f32 %v2365_v28, %v1308_v11  ;;  %p1992_p11 = scmp.lt.s32.totalorder %s1523_s0, %s1523_s0 }
0x1d34   :  { %v1310_v13 = vmul.f32 1.442695, %v1309_v12 }
0x1d36   :  { %1893 = vpow2.f32 %v1310_v13  ;;  %v1400_v13 = vrot.slane %v1399_v10, 1 }
0x1d3b   :  { %v1892_v14 = vpop.eup %1891 }
0x1d3c   :  { %v1295_v15 = vmul.f32 %v1892_v14, %v1890_v48  ;;  %v1367_v48 = vrot.slane %v1366_v47, 2 }
0x1d3e   :  { %1296 = vst.msk [vmem:[%s2483_s8] sm:$0x3] %vm1268_vm6, %v1295_v15  ;;  %v1368_v52 = vmax.f32 %v1366_v47, %v1367_v48 }
0x1d40   :  { %v1894_v16 = vpop.eup %1893  ;;  %v1369_v56 = vrot.slane %v1368_v52, 1 }
0x1d41   :  { %v1313_v17 = vrot.slane %v1894_v16, 2 }
0x1d42   :  { %v1370_v59 = vmax.f32 %v1368_v52, %v1369_v56 }
0x1d43   :  { %v1315_v18 = vsel %vm1268_vm6, %v1313_v17, 0.0 }
0x1d44   :  { %1316 = vadd.xlane.f32.xlu0 %v1315_v18 }
0x1dd1   :  { %v1317_v23 = vpop.xlane.xlu0 %1316 }
0x1dd2   :  { %v1318_v24 = vrot.slane %v1317_v23, 4 }
0x1dd4   :  { %v1319_v25 = vadd.f32 %v1318_v24, %v1317_v23 }
0x1dd6   :  { %v1320_v0 = vrot.slane %v1319_v25, 2 }
0x1dd8   :  { %v1321_v27 = vadd.f32 %v1320_v0, %v1319_v25  ;;  %v1424_v25 = vrot.slane %v2390_v62, 4 }
0x1dda   :  { %v1322_v29 = vrot.slane %v1321_v27, 1  ;;  %v1425_v26 = vmax.f32 %v2390_v62, %v1424_v25 }
0x1ddc   :  { %v1323_v32 = vadd.f32 %v1322_v29, %v1321_v27  ;;  %v1426_v0 = vrot.slane %v1425_v26, 2 }
0x1dde   :  { %1770 = vpush %v1323_v32  ;;  %v1427_v32 = vmax.f32 %v1425_v26, %v1426_v0 }
0x1ddf   :  { %1772 = vpush %v1338_v33 }
0x1e0f   :  { %s1771_s24 = spop %1770 }
0x1e10   :  { %v1325_v34 = vstv %s1771_s24  ;;  %s1773_s13 = spop %1772  ;;  %s1987_s24 = scalar_lea.vmem %s1523_s0, 32 }
0x1e11   :  { %1895 = vrcp.f32 %v1325_v34  ;;  %v1340_v35 = vstv %s1773_s13  ;;  %p1988_p10 = scmp.ne.s32.totalorder %s1523_s0, %s1987_s24  ;;  %p1993_p12 = scmp.lt.s32.totalorder %s1987_s24, %s1987_s24 }
0x1e12   :  { %v1341_v36 = vsub.f32 %v2365_v28, %v1340_v35  ;;  %v1428_v35 = vrot.slane %v1427_v32, 1 }
0x1e13   :  { %p1994_p13 = por %p1993_p12, %p1992_p11 }
0x1e14   :  { %v1342_v37 = vmul.f32 1.442695, %v1341_v36 }
0x1e15   :  { %p1995_p0 = pnand %p1994_p13, %p1988_p10 }
0x1e16   :  { %1897 = vpow2.f32 %v1342_v37 }
0x1e1b   :  { %v1896_v38 = vpop.eup %1895 }
0x1e1c   :  { %v1327_v39 = vmul.f32 %v1896_v38, %v1894_v16  ;;  %v1401_v16 = vmax.f32 %v1399_v10, %v1400_v13  ;;  %v1429_v38 = vmax.f32 %v1427_v32, %v1428_v35 }
0x1e1e   :  { %1328 = vst.msk [vmem:[%s2483_s8] sm:$0xc] %vm1297_vm7, %v1327_v39 }
0x1e20   :  { %v1898_v40 = vpop.eup %1897 }
0x1e21   :  { %v1345_v41 = vrot.slane %v1898_v40, 4 }
0x1e23   :  { %v1347_v43 = vsel %vm1268_vm6, %v1345_v41, 0.0 }
0x1e24   :  { %1348 = vadd.xlane.f32.xlu0 %v1347_v43 }
0x1eb1   :  { %v1349_v49 = vpop.xlane.xlu0 %1348 }
0x1eb2   :  { %v1350_v50 = vrot.slane %v1349_v49, 4 }
0x1eb4   :  { %v1351_v51 = vadd.f32 %v1350_v50, %v1349_v49  ;;  %v1455_v50 = vrot.slane %v2392_v30, 4 }
0x1eb6   :  { %v1352_v53 = vrot.slane %v1351_v51, 2 }
0x1eb8   :  { %v1353_v54 = vadd.f32 %v1352_v53, %v1351_v51  ;;  %v1456_v51 = vmax.f32 %v2392_v30, %v1455_v50 }
0x1eba   :  { %v1354_v57 = vrot.slane %v1353_v54, 1  ;;  %v1457_v52 = vrot.slane %v1456_v51, 2 }
0x1ebc   :  { %v1355_v58 = vadd.f32 %v1354_v57, %v1353_v54  ;;  %v1458_v57 = vmax.f32 %v1456_v51, %v1457_v52 }
0x1ebe   :  { %1774 = vpush %v1355_v58 }
0x1ebf   :  { %1776 = vpush %v1370_v59 }
0x1eef   :  { %s1775_s17 = spop %1774 }
0x1ef0   :  { %v1357_v4 = vstv %s1775_s17  ;;  %s1777_s3 = spop %1776 }
0x1ef1   :  { %1899 = vrcp.f32 %v1357_v4  ;;  %v1372_v60 = vstv %s1777_s3  ;;  %v1459_v4 = vrot.slane %v1458_v57, 1 }
0x1ef2   :  { %v1373_v61 = vsub.f32 %v2365_v28, %v1372_v60 }
0x1ef4   :  { %v1374_v63 = vmul.f32 1.442695, %v1373_v61 }
0x1ef6   :  { %1901 = vpow2.f32 %v1374_v63  ;;  %v1460_v63 = vmax.f32 %v1458_v57, %v1459_v4 }
0x1efb   :  { %v1900_v21 = vpop.eup %1899 }
0x1efc   :  { %v1359_v2 = vmul.f32 %v1900_v21, %v1898_v40 }
0x1efe   :  { %1360 = vst.msk [vmem:[%s2483_s8] sm:$0x30] %vm1329_vm8, %v1359_v2 }
0x1f00   :  { %v1902_v7 = vpop.eup %1901 }
0x1f01   :  { %v1377_v55 = vrot.slane %v1902_v7, 6 }
0x1f03   :  { %v1379_v42 = vsel %vm1268_vm6, %v1377_v55, 0.0 }
0x1f04   :  { %1380 = vadd.xlane.f32.xlu0 %v1379_v42 }
0x1f91   :  { %v1381_v28 = vpop.xlane.xlu0 %1380 }
0x1f92   :  { %v1382_v45 = vrot.slane %v1381_v28, 4 }
0x1f94   :  { %v1383_v9 = vadd.f32 %v1382_v45, %v1381_v28  ;;  %v1486_v28 = vrot.slane %v2394_v8, 4 }
0x1f96   :  { %v1384_v11 = vrot.slane %v1383_v9, 2  ;;  %v1487_v45 = vmax.f32 %v2394_v8, %v1486_v28 }
0x1f98   :  { %v1385_v12 = vadd.f32 %v1384_v11, %v1383_v9  ;;  %v1488_v9 = vrot.slane %v1487_v45, 2 }
0x1f9a   :  { %v1386_v14 = vrot.slane %v1385_v12, 1  ;;  %v1489_v13 = vmax.f32 %v1487_v45, %v1488_v9 }
0x1f9c   :  { %v1387_v15 = vadd.f32 %v1386_v14, %v1385_v12 }
0x1f9e   :  { %1778 = vpush %v1387_v15 }
0x1f9f   :  { %1780 = vpush %v1401_v16  ;;  %v1490_v16 = vrot.slane %v1489_v13, 1 }
0x1fcf   :  { %s1779_s19 = spop %1778 }
0x1fd0   :  { %v1389_v17 = vstv %s1779_s19  ;;  %s1781_s20 = spop %1780 }
0x1fd1   :  { %1903 = vrcp.f32 %v1389_v17  ;;  %v1403_v18 = vstv %s1781_s20 }
0x1fd2   :  { %v1404_v44 = vsub.f32 %v2367_v31, %v1403_v18 }
0x1fd4   :  { %v1405_v19 = vmul.f32 1.442695, %v1404_v44  ;;  %v1491_v44 = vmax.f32 %v1489_v13, %v1490_v16 }
0x1fd6   :  { %1905 = vpow2.f32 %v1405_v19 }
0x1fdb   :  { %v1904_v20 = vpop.eup %1903 }
0x1fdc   :  { %v1391_v22 = vmul.f32 %v1904_v20, %v1902_v7 }
0x1fde   :  { %1392 = vst.msk [vmem:[%s2483_s8] sm:$0xc0] %vm1361_vm9, %v1391_v22 }
0x1fe0   :  { %v1906_v23 = vpop.eup %1905 }
0x1fe1   :  { %v1407_v24 = vsel %vm1268_vm6, %v1906_v23, 0.0 }
0x1fe2   :  { %1408 = vadd.xlane.f32.xlu0 %v1407_v24 }
0x206f   :  { %v1409_v27 = vpop.xlane.xlu0 %1408 }
0x2070   :  { %v1410_v1 = vrot.slane %v1409_v27, 4 }
0x2072   :  { %v1411_v29 = vadd.f32 %v1410_v1, %v1409_v27 }
0x2074   :  { %v1412_v33 = vrot.slane %v1411_v29, 2 }
0x2076   :  { %v1413_v34 = vadd.f32 %v1412_v33, %v1411_v29 }
0x2078   :  { %v1414_v36 = vrot.slane %v1413_v34, 1 }
0x207a   :  { %v1415_v37 = vadd.f32 %v1414_v36, %v1413_v34 }
0x207c   :  { %1782 = vpush %v1415_v37 }
0x207d   :  { %1784 = vpush %v1429_v38 }
0x20ad   :  { %s1783_s5 = spop %1782 }
0x20ae   :  { %v1417_v39 = vstv %s1783_s5  ;;  %s1785_s22 = spop %1784 }
0x20af   :  { %1907 = vrcp.f32 %v1417_v39  ;;  %v1431_v40 = vstv %s1785_s22 }
0x20b0   :  { %v1432_v62 = vsub.f32 %v2367_v31, %v1431_v40 }
0x20b2   :  { %v1433_v41 = vmul.f32 1.442695, %v1432_v62 }
0x20b4   :  { %1909 = vpow2.f32 %v1433_v41 }
0x20b9   :  { %v1908_v43 = vpop.eup %1907 }
0x20ba   :  { %v1419_v46 = vmul.f32 %v1908_v43, %v1906_v23 }
0x20bc   :  { %1420 = vst.msk [vmem:[%s2483_s8 + $0x8] sm:$0x3] %vm1268_vm6, %v1419_v46 }
0x20be   :  { %v1910_v47 = vpop.eup %1909 }
0x20bf   :  { %v1436_v48 = vrot.slane %v1910_v47, 2 }
0x20c1   :  { %v1438_v49 = vsel %vm1268_vm6, %v1436_v48, 0.0 }
0x20c2   :  { %1439 = vadd.xlane.f32.xlu0 %v1438_v49 }
0x214f   :  { %v1440_v53 = vpop.xlane.xlu0 %1439 }
0x2150   :  { %v1441_v54 = vrot.slane %v1440_v53, 4 }
0x2152   :  { %v1442_v56 = vadd.f32 %v1441_v54, %v1440_v53 }
0x2154   :  { %v1443_v58 = vrot.slane %v1442_v56, 2 }
0x2156   :  { %v1444_v59 = vadd.f32 %v1443_v58, %v1442_v56 }
0x2158   :  { %v1445_v60 = vrot.slane %v1444_v59, 1 }
0x215a   :  { %v1446_v61 = vadd.f32 %v1445_v60, %v1444_v59 }
0x215c   :  { %1786 = vpush %v1446_v61 }
0x215d   :  { %1788 = vpush %v1460_v63 }
0x218d   :  { %s1787_s27 = spop %1786 }
0x218e   :  { %v1448_v21 = vstv %s1787_s27  ;;  %s1789_s29 = spop %1788 }
0x218f   :  { %1911 = vrcp.f32 %v1448_v21  ;;  %v1462_v2 = vstv %s1789_s29 }
0x2190   :  { %v1463_v30 = vsub.f32 %v2367_v31, %v1462_v2 }
0x2192   :  { %v1464_v7 = vmul.f32 1.442695, %v1463_v30 }
0x2194   :  { %1913 = vpow2.f32 %v1464_v7 }
0x2199   :  { %v1912_v55 = vpop.eup %1911 }
0x219a   :  { %v1450_v42 = vmul.f32 %v1912_v55, %v1910_v47 }
0x219c   :  { %1451 = vst.msk [vmem:[%s2483_s8 + $0x8] sm:$0xc] %vm1297_vm7, %v1450_v42 }
0x219e   :  { %v1914_v3 = vpop.eup %1913 }
0x219f   :  { %v1467_v5 = vrot.slane %v1914_v3, 4 }
0x21a1   :  { %v1469_v6 = vsel %vm1268_vm6, %v1467_v5, 0.0 }
0x21a2   :  { %1470 = vadd.xlane.f32.xlu0 %v1469_v6 }
0x222f   :  { %v1471_v10 = vpop.xlane.xlu0 %1470 }
0x2230   :  { %v1472_v11 = vrot.slane %v1471_v10, 4 }
0x2232   :  { %v1473_v12 = vadd.f32 %v1472_v11, %v1471_v10 }
0x2234   :  { %v1474_v14 = vrot.slane %v1473_v12, 2 }
0x2236   :  { %v1475_v15 = vadd.f32 %v1474_v14, %v1473_v12 }
0x2238   :  { %v1476_v17 = vrot.slane %v1475_v15, 1 }
0x223a   :  { %v1477_v18 = vadd.f32 %v1476_v17, %v1475_v15 }
0x223c   :  { %1790 = vpush %v1477_v18 }
0x223d   :  { %1792 = vpush %v1491_v44 }
0x226d   :  { %s1791_s23 = spop %1790 }
0x226e   :  { %v1479_v19 = vstv %s1791_s23  ;;  %s1793_s30 = spop %1792 }
0x226f   :  { %1915 = vrcp.f32 %v1479_v19  ;;  %v1493_v20 = vstv %s1793_s30 }
0x2270   :  { %v1494_v8 = vsub.f32 %v2367_v31, %v1493_v20 }
0x2272   :  { %v1495_v22 = vmul.f32 1.442695, %v1494_v8 }
0x2274   :  { %1917 = vpow2.f32 %v1495_v22 }
0x2279   :  { %v1916_v23 = vpop.eup %1915 }
0x227a   :  { %v1481_v24 = vmul.f32 %v1916_v23, %v1914_v3 }
0x227c   :  { %1482 = vst.msk [vmem:[%s2483_s8 + $0x8] sm:$0x30] %vm1329_vm8, %v1481_v24 }
0x227e   :  { %v1918_v25 = vpop.eup %1917 }
0x227f   :  { %v1498_v26 = vrot.slane %v1918_v25, 6 }
0x2281   :  { %v1500_v0 = vsel %vm1268_vm6, %v1498_v26, 0.0 }
0x2282   :  { %1501 = vadd.xlane.f32.xlu0 %v1500_v0 }
0x2283   :  { %1998 = shalt.err (!%p1995_p0)
}
0x2284   :  { %s1999_s16 = scalar_lea.hbm %s2484_s9, 32 }
0x2285   :  { %p2000_p1 = scmp.ne.s32.totalorder %s2484_s9, %s1999_s16  ;;  %p2003_p2 = scmp.lt.u32.totalorder %s1999_s16, %s2484_s9 }
0x2287   :  { %p2005_p3 = pnand %p2003_p2, %p2000_p1 }
0x2289   :  { %2008 = shalt.err (!%p2005_p3)
}
0x228a   :  { %1525 = dma.vmem_to_hbm [thread:$0]  %s1523_s0, 32, %s2484_s9, [#allocation5]  }
0x228b   :  { %s2009_s21 = scalar_lea.vmem %s1533_s6, 32  ;;  %p2014_p5 = scmp.lt.s32.totalorder %s1533_s6, %s1533_s6 }
0x228c   :  { %p2010_p4 = scmp.ne.s32.totalorder %s1533_s6, %s2009_s21  ;;  %p2015_p6 = scmp.lt.s32.totalorder %s2009_s21, %s2009_s21 }
0x228e   :  { %p2016_p7 = por %p2015_p6, %p2014_p5 }
0x2290   :  { %p2017_p8 = pnand %p2016_p7, %p2010_p4 }
0x2292   :  { %2020 = shalt.err (!%p2017_p8)
}
0x2293   :  { %s2021_s22 = scalar_lea.hbm %s2485_s10, 32 }
0x2294   :  { %p2022_p9 = scmp.ne.s32.totalorder %s2485_s10, %s2021_s22  ;;  %p2025_p10 = scmp.lt.u32.totalorder %s2021_s22, %s2485_s10 }
0x2296   :  { %p2027_p11 = pnand %p2025_p10, %p2022_p9 }
0x2298   :  { %2030 = shalt.err (!%p2027_p11)
}
0x2299   :  { %1535 = dma.vmem_to_hbm [thread:$0]  %s1533_s6, 32, %s2485_s10, [#allocation11]  }
0x230f   :  { %v1502_v31 = vpop.xlane.xlu0 %1501 }
0x2310   :  { %v1503_v27 = vrot.slane %v1502_v31, 4 }
0x2312   :  { %v1504_v1 = vadd.f32 %v1503_v27, %v1502_v31 }
0x2314   :  { %v1505_v29 = vrot.slane %v1504_v1, 2 }
0x2316   :  { %v1506_v32 = vadd.f32 %v1505_v29, %v1504_v1 }
0x2318   :  { %v1507_v33 = vrot.slane %v1506_v32, 1 }
0x231a   :  { %v1508_v34 = vadd.f32 %v1507_v33, %v1506_v32 }
0x231c   :  { %1794 = vpush %v1508_v34 }
0x234d   :  { %s1795_s7 = spop %1794 }
0x234e   :  { %v1510_v35 = vstv %s1795_s7 }
0x234f   :  { %1919 = vrcp.f32 %v1510_v35 }
0x2359   :  { %v1920_v36 = vpop.eup %1919 }
0x235a   :  { %v1512_v37 = vmul.f32 %v1920_v36, %v1918_v25 }
0x235c   :  { %1513 = vst.msk [vmem:[%s2483_s8 + $0x8] sm:$0xc0] %vm1361_vm9, %v1512_v37 }
0x235d   :  { %2035 = dma.done.wait [#allocation5], 32  }
0x235e   :  { %2036 = vsyncadd [#allocation5], 4294967264 }
0x235f   :  { %2037 = dma.done.wait [#allocation11], 32  }
0x2360   :  { %2038 = vsyncadd [#allocation11], 4294967264 }
0x2361   :  { %1544 = vsyncpa [#allocation4], 1 }
0x2362   :  { %1545 = vsyncpa [#allocation7], 1 }
0x2363   :  { %1546 = vsyncpa [#allocation5], 1 }
0x2364   :  { %1547 = vsyncpa [#allocation11], 1 }

</bundles_post_ra>
